<compile_context>
chip_gen: v6e
topology: v6e:2x2x1
jax: 0.10.0
libtpu: 0.0.40
codegen_flags: <defaults>
</compile_context>

<pallas_src>
import functools

import jax
import jax.numpy as jnp
from jax import lax
from jax.experimental import pallas as pl
from jax.experimental.pallas import tpu as pltpu

EPS = 1e-5
LANE = 128          # output-channel (lane) padding target


def _round_up(v, m):
    return (v + m - 1) // m * m


def _tpu_config():
    """Per-generation tile sizes / VMEM budget."""
    try:
        kind = jax.devices()[0].device_kind.lower()
    except Exception:  # pragma: no cover
        kind = ""
    if any(t in kind for t in ("v2", "v3", "v4", "v5")):
        # 128-deep MXU generations (v5e: 4x128^2, lowest HBM BW -> big epilogue tiles).
        return {"tk": 128, "tm_max": 256, "epi_rows": 1024, "vmem": 64 * 2**20}
    if "v7" in kind:
        # 2x256^2 MXU but only 64 MiB VMEM per TensorCore -> keep budget tight.
        return {"tk": 256, "tm_max": 256, "epi_rows": 1024, "vmem": 40 * 2**20}
    # v6e default: 2x256^2 MXU, 128 MiB physical VMEM.
    return {"tk": 256, "tm_max": 512, "epi_rows": 2048, "vmem": 64 * 2**20}


# ---------------------------------------------------------------------------
# Pallas kernels
# ---------------------------------------------------------------------------
def _gemm_stats_kernel(p_ref, w_ref, y_ref, stat_ref, acc_ref, *, tk):
    """y = patches @ weights (bf16 in, f32 acc, bf16 out) + BN partial sums.

    w_ref holds the *whole* (Kpad, NC) weight resident in VMEM; the K tile is
    sliced inside the kernel so the weight is never re-fetched per M tile.
    """
    k = pl.program_id(1)

    @pl.when(k == 0)
    def _():
        acc_ref[...] = jnp.zeros_like(acc_ref)

    off = pl.multiple_of(k * tk, tk)
    acc_ref[...] += jnp.dot(p_ref[...], w_ref[pl.ds(off, tk), :],
                            preferred_element_type=jnp.float32)

    @pl.when(k == pl.num_programs(1) - 1)
    def _():
        acc = acc_ref[...]
        y_ref[...] = acc.astype(y_ref.dtype)                      # bf16 writeback
        s = jnp.sum(acc, axis=0, keepdims=True)                   # (1, NC) f32
        ss = jnp.sum(acc * acc, axis=0, keepdims=True)            # (1, NC) f32
        stat_ref[...] = jnp.concatenate([s, ss], axis=0).reshape(stat_ref.shape)


def _residual_relu_kernel(y_ref, s_ref, b_ref, r_ref, sd_ref, bd_ref, o_ref):
    """out = relu(bn2(y2) + bn_d(residual))  (all math in f32)."""
    v = (y_ref[...].astype(jnp.float32) * s_ref[...] + b_ref[...]
         + r_ref[...].astype(jnp.float32) * sd_ref[...] + bd_ref[...])
    o_ref[...] = jnp.maximum(v, 0.0).astype(o_ref.dtype)


# ---------------------------------------------------------------------------
# pallas_call wrappers
# ---------------------------------------------------------------------------
def _gemm_with_stats(p_bf16, w_bf16, tm, tk, vmem_limit):
    mp, kp = p_bf16.shape
    _, nc = w_bf16.shape
    nm, nk = mp // tm, kp // tk
    return pl.pallas_call(
        functools.partial(_gemm_stats_kernel, tk=tk),
        out_shape=(jax.ShapeDtypeStruct((mp, nc), jnp.bfloat16),
                   jax.ShapeDtypeStruct((nm, 2, nc), jnp.float32)),
        grid_spec=pltpu.PrefetchScalarGridSpec(
            num_scalar_prefetch=0,
            grid=(nm, nk),
            in_specs=[pl.BlockSpec((tm, tk), lambda i, k: (i, k)),
                      # whole weight, constant block index -> VMEM-resident,
                      # fetched from HBM exactly once per call.
                      pl.BlockSpec((kp, nc), lambda i, k: (0, 0))],
            out_specs=[pl.BlockSpec((tm, nc), lambda i, k: (i, 0)),
                       pl.BlockSpec((1, 2, nc), lambda i, k: (i, 0, 0))],
            scratch_shapes=[pltpu.VMEM((tm, nc), jnp.float32)]),
        compiler_params=pltpu.CompilerParams(
            dimension_semantics=("parallel", "arbitrary"),
            vmem_limit_bytes=vmem_limit),
    )(p_bf16, w_bf16)


def _residual_relu(y2, s2, b2, res, sd, bd, te, cpad, res_lane_blk, vmem_limit):
    mp = y2.shape[0]
    nm = mp // te
    return pl.pallas_call(
        _residual_relu_kernel,
        out_shape=jax.ShapeDtypeStruct((mp, cpad), jnp.float32),
        grid_spec=pltpu.PrefetchScalarGridSpec(
            num_scalar_prefetch=0,
            grid=(nm,),
            in_specs=[pl.BlockSpec((te, cpad), lambda i: (i, 0)),
                      pl.BlockSpec((1, cpad), lambda i: (0, 0)),
                      pl.BlockSpec((1, cpad), lambda i: (0, 0)),
                      pl.BlockSpec((te, cpad), lambda i: (i, res_lane_blk)),
                      pl.BlockSpec((1, cpad), lambda i: (0, 0)),
                      pl.BlockSpec((1, cpad), lambda i: (0, 0))],
            out_specs=pl.BlockSpec((te, cpad), lambda i: (i, 0))),
        compiler_params=pltpu.CompilerParams(
            dimension_semantics=("parallel",),
            vmem_limit_bytes=vmem_limit),
    )(y2, s2, b2, res, sd, bd)


# ---------------------------------------------------------------------------
# Plain-JAX glue (layout only, no heavy compute)
# ---------------------------------------------------------------------------
def _im2col3x3_bf16(x, stride, m_pad, k_pad):
    """(mp, kp) bf16 patch matrix for a 3x3/pad=1 conv, padding folded in.

    TODO(synk): implicit GEMM (shifted-window taps inside the kernel) would
    avoid materializing this 9x-amplified matrix entirely.
    """
    n, h, w, c = x.shape
    ho = (h + 2 - 3) // stride + 1
    wo = (w + 2 - 3) // stride + 1
    xp = jnp.pad(x.astype(jnp.bfloat16), ((0, 0), (1, 1), (1, 1), (0, 0)))
    cols = [xp[:, dh:dh + (ho - 1) * stride + 1:stride,
                  dw:dw + (wo - 1) * stride + 1:stride, :]
            for dh in range(3) for dw in range(3)]
    patches = jnp.concatenate(cols, axis=-1).reshape(n * ho * wo, 9 * c)
    m = n * ho * wo
    patches = jnp.pad(patches, ((0, m_pad - m), (0, k_pad - 9 * c)))
    return patches, (ho, wo)


def _pad1d(v, n):
    return jnp.zeros((n,), jnp.float32).at[:v.shape[0]].set(v)


def _bn_fold(stats, m_real, gamma_pad, beta_pad):
    """Fold training-mode batch stats into per-channel scale/shift (f32)."""
    total = jnp.sum(stats, axis=0)                      # (2, NC)
    mean = total[0] / m_real
    # TODO(synk): E[x^2]-E[x]^2 cancels badly for very large M; use Welford /
    # two-pass centered sums for production shapes.
    var = jnp.maximum(total[1] / m_real - mean * mean, 0.0)
    scale = gamma_pad * lax.rsqrt(var + EPS)
    shift = beta_pad - mean * scale
    return scale.reshape(1, -1), shift.reshape(1, -1)


# ---------------------------------------------------------------------------
# Parameters (deterministic synthetic init — shapes match BasicBlock.__init__)
# ---------------------------------------------------------------------------
def init_params(key, cin, cout, downsample):
    ks = jax.random.split(key, 9)
    p = {
        "w1": 0.1 * jax.random.normal(ks[0], (3, 3, cin, cout), jnp.float32),
        "g1": 1.0 + 0.1 * jax.random.normal(ks[1], (cout,), jnp.float32),
        "b1": 0.1 * jax.random.normal(ks[2], (cout,), jnp.float32),
        "w2": 0.1 * jax.random.normal(ks[3], (3, 3, cout, cout), jnp.float32),
        "g2": 1.0 + 0.1 * jax.random.normal(ks[4], (cout,), jnp.float32),
        "b2": 0.1 * jax.random.normal(ks[5], (cout,), jnp.float32),
    }
    if downsample:
        p["wd"] = 0.1 * jax.random.normal(ks[6], (cin, cout), jnp.float32)
        p["gd"] = 1.0 + 0.1 * jax.random.normal(ks[7], (cout,), jnp.float32)
        p["bd"] = 0.1 * jax.random.normal(ks[8], (cout,), jnp.float32)
    return p


# ---------------------------------------------------------------------------
# BasicBlock forward (Pallas)
# ---------------------------------------------------------------------------
def basic_block_forward(x_nchw, params, stride, downsample):
    cfg = _tpu_config()
    tk, vmem = cfg["tk"], cfg["vmem"]

    x = jnp.transpose(x_nchw, (0, 2, 3, 1)).astype(jnp.float32)   # NCHW -> NHWC
    n, h, w, cin = x.shape
    cout = params["w1"].shape[-1]
    cp = _round_up(cout, LANE)

    ho = (h + 2 - 3) // stride + 1
    wo = (w + 2 - 3) // stride + 1
    m = n * ho * wo
    # Split M into >=2 tiles when it is small (keeps both v7x TensorCores
    # busy through the "parallel" M axis), capped per generation.
    tm = min(cfg["tm_max"], _round_up(pl.cdiv(m, 2), 8))
    mp = _round_up(m, tm)
    nm = mp // tm
    # Epilogue tile decoupled from GEMM tm: largest multiple of tm that
    # divides mp and stays under the per-gen row cap (mem-bound kernel ->
    # biggest tile that fits).
    te = tm
    for d in range(nm, 0, -1):
        if nm % d == 0 and d * tm <= cfg["epi_rows"]:
            te = d * tm
            break

    # ---- conv1 (3x3/stride/pad=1) GEMM; 1x1 downsample conv rides as extra
    #      lane columns fed by the centre tap of the 3x3 patches. -------------
    k1 = 9 * cin
    k1p = _round_up(k1, tk)
    p1p, _ = _im2col3x3_bf16(x, stride, mp, k1p)

    nc1 = 2 * cp if downsample else cp
    w_cat = jnp.zeros((k1p, nc1), jnp.float32)
    w_cat = w_cat.at[:k1, :cout].set(params["w1"].reshape(k1, cout))
    g_cat = _pad1d(params["g1"], nc1)
    b_cat = _pad1d(params["b1"], nc1)
    if downsample:
        # Centre tap rows (dh=dw=1) of the patches are exactly x[:, ::s, ::s, :],
        # so the 1x1 stride-s conv shares the same GEMM operand.
        w_cat = w_cat.at[4 * cin:5 * cin, cp:cp + cout].set(params["wd"])
        g_cat = g_cat.at[cp:cp + cout].set(params["gd"])
        b_cat = b_cat.at[cp:cp + cout].set(params["bd"])

    y_cat, stats1 = _gemm_with_stats(p1p, w_cat.astype(jnp.bfloat16), tm, tk, vmem)
    scale1, shift1 = _bn_fold(stats1, m, g_cat, b_cat)            # (1, nc1) f32

    # ---- bn1 + ReLU folded into conv2's patch build (plain-JAX, fused by XLA
    #      into the pad/concat write) — no standalone elementwise pass. It must
    #      happen before the spatial zero-pad, otherwise padded zeros would
    #      become relu(shift) != 0 inside the conv2 GEMM. ---------------------
    y1 = jnp.maximum(
        y_cat[:m, :cout].astype(jnp.float32).reshape(n, ho, wo, cout)
        * scale1[:, :cout] + shift1[:, :cout], 0.0)

    # ---- conv2 (3x3 / stride 1 / pad=1) GEMM ---------------------------------
    k2 = 9 * cout
    k2p = _round_up(k2, tk)
    p2p, _ = _im2col3x3_bf16(y1, 1, mp, k2p)
    w2p = jnp.zeros((k2p, cp), jnp.float32).at[:k2, :cout].set(
        params["w2"].reshape(k2, cout))
    y2, stats2 = _gemm_with_stats(p2p, w2p.astype(jnp.bfloat16), tm, tk, vmem)
    scale2, shift2 = _bn_fold(stats2, m, _pad1d(params["g2"], cp),
                              _pad1d(params["b2"], cp))

    # ---- epilogue: bn2 + residual (downsample BN folded here) + relu ---------
    if downsample:
        res, res_blk = y_cat, 1                   # raw 1x1-conv lanes (bf16)
        sd, bd = scale1[:, cp:], shift1[:, cp:]
    else:
        assert cin == cout and stride == 1, (
            "identity residual requires in_channels == out_channels and stride == 1")
        # bf16 residual (halves HBM read traffic of the final mem-bound pass)
        res = jnp.zeros((mp, cp), jnp.bfloat16).at[:m, :cin].set(
            x.reshape(m, cin).astype(jnp.bfloat16))
        res_blk = 0
        sd = jnp.ones((1, cp), jnp.float32)
        bd = jnp.zeros((1, cp), jnp.float32)

    out = _residual_relu(y2, scale2, shift2, res, sd, bd, te, cp, res_blk, vmem)
    out = out[:m, :cout].reshape(n, ho, wo, cout)
    return jnp.transpose(out, (0, 3, 1, 2))                       # NHWC -> NCHW


# ---------------------------------------------------------------------------
# Pure-JAX reference (bf16 conv inputs / f32 accumulation, matching the kernel)
# ---------------------------------------------------------------------------
def _ref_forward(x_nchw, params, stride, downsample):
    x = jnp.transpose(x_nchw, (0, 2, 3, 1)).astype(jnp.float32)

    def conv(v, w, s, pad):
        return lax.conv_general_dilated(
            v.astype(jnp.bfloat16), w.astype(jnp.bfloat16), (s, s), pad,
            dimension_numbers=("NHWC", "HWIO", "NHWC"),
            preferred_element_type=jnp.float32)

    def bn(y, g, b):
        mean = y.mean(axis=(0, 1, 2))
        var = ((y - mean) ** 2).mean(axis=(0, 1, 2))
        return (y - mean) * lax.rsqrt(var + EPS) * g + b

    y = jnp.maximum(bn(conv(x, params["w1"], stride, ((1, 1), (1, 1))),
                       params["g1"], params["b1"]), 0.0)
    y = bn(conv(y, params["w2"], 1, ((1, 1), (1, 1))), params["g2"], params["b2"])
    if downsample:
        wd = params["wd"].reshape(1, 1, *params["wd"].shape)
        i = bn(conv(x, wd, stride, "VALID"), params["gd"], params["bd"])
    else:
        i = x
    return jnp.transpose(jnp.maximum(y + i, 0.0), (0, 3, 1, 2))


if __name__ == "__main__":
    key = jax.random.PRNGKey(0)
    kx, kpa, kpb = jax.random.split(key, 3)
    x = jax.random.normal(kx, (2, 4, 16, 16), jnp.float32)   # NCHW, like PyTorch

    # Config A: identity residual (Cin == Cout, stride 1, no downsample)
    params_a = init_params(kpa, cin=4, cout=4, downsample=False)
    fwd_a = jax.jit(functools.partial(basic_block_forward, stride=1, downsample=False))
    out_a = jax.block_until_ready(fwd_a(x, params_a))
    ref_a = _ref_forward(x, params_a, 1, False)
    assert out_a.shape == (2, 4, 16, 16)
    assert jnp.allclose(out_a, ref_a, rtol=2e-2, atol=2e-2), \
        float(jnp.max(jnp.abs(out_a - ref_a)))

    # Config B: projection residual (channel expansion + stride-2 downsample)
    params_b = init_params(kpb, cin=4, cout=8, downsample=True)
    fwd_b = jax.jit(functools.partial(basic_block_forward, stride=2, downsample=True))
    out_b = jax.block_until_ready(fwd_b(x, params_b))
    ref_b = _ref_forward(x, params_b, 2, True)
    assert out_b.shape == (2, 8, 8, 8)
    assert jnp.allclose(out_b, ref_b, rtol=2e-2, atol=2e-2), \
        float(jnp.max(jnp.abs(out_b - ref_b)))

    print("KERNEL_OK")
</pallas_src>

<mosaic_0001>
module attributes {stable_mosaic.version = 11 : i64} {
  func.func @_gemm_stats_kernel(%arg0: i32, %arg1: i32, %arg2: memref<256x256xbf16, #tpu.memory_space<vmem>>, %arg3: memref<256x128xbf16, #tpu.memory_space<vmem>>, %arg4: memref<256x128xbf16, #tpu.memory_space<vmem>>, %arg5: memref<1x2x128xf32, #tpu.memory_space<vmem>>, %arg6: memref<256x128xf32, #tpu.memory_space<vmem>>) attributes {dimension_semantics = [#tpu.dimension_semantics<parallel>, #tpu.dimension_semantics<arbitrary>], iteration_bounds = array<i64: 2, 1>, scalar_prefetch = 0 : i64, scratch_operands = 1 : i64, tpu.core_type = #tpu.core_type<tc>, window_params = [{transform_indices = @transform_0, window_bounds = array<i64: 256, 256>}, {pipeline_mode = #tpu.pipeline_mode<synchronous>, transform_indices = @transform_1, window_bounds = array<i64: 256, 128>}, {transform_indices = @transform_2, window_bounds = array<i64: 256, 128>}, {transform_indices = @transform_3, window_bounds = array<i64: 1, 2, 128>}]} {
    %c0_i32 = arith.constant 0 : i32
    %0 = arith.cmpi eq, %arg1, %c0_i32 : i32
    %1 = arith.extui %0 : i1 to i32
    %c0_i32_0 = arith.constant 0 : i32
    %2 = arith.cmpi ne, %1, %c0_i32_0 : i32
    scf.if %2 {
      %cst_9 = arith.constant 0.000000e+00 : f32
      %15 = vector.broadcast %cst_9 : f32 to vector<256x128xf32>
      %c0_10 = arith.constant 0 : index
      %c0_11 = arith.constant 0 : index
      %16 = vector.load %arg6[%c0_10, %c0_11] : memref<256x128xf32, #tpu.memory_space<vmem>>, vector<256x128xf32>
      tpu.vector_store %arg6[%c0_10, %c0_11], %15 {strides = array<i32>} : memref<256x128xf32, #tpu.memory_space<vmem>>, vector<256x128xf32>,
    } else {
    }
    %c256_i32 = arith.constant 256 : i32
    %3 = arith.muli %arg1, %c256_i32 : i32
    %4 = tpu.assume_multiple %3, 256 : i32
    %c0 = arith.constant 0 : index
    %c0_1 = arith.constant 0 : index
    %5 = vector.load %arg6[%c0, %c0_1] : memref<256x128xf32, #tpu.memory_space<vmem>>, vector<256x128xf32>
    %c0_2 = arith.constant 0 : index
    %c0_3 = arith.constant 0 : index
    %6 = vector.load %arg2[%c0_2, %c0_3] : memref<256x256xbf16, #tpu.memory_space<vmem>>, vector<256x256xbf16>
    %7 = arith.index_cast %4 : i32 to index
    %c0_4 = arith.constant 0 : index
    %8 = vector.load %arg3[%7, %c0_4] : memref<256x128xbf16, #tpu.memory_space<vmem>>, vector<256x128xbf16>
    %cst = arith.constant dense<0.000000e+00> : vector<256x128xf32>
    %9 = tpu.matmul %6, %8, %cst {dimension_numbers = #tpu.dot_dimension_numbers<[1], [0], [0], [1], [0, 0, 1, 1], [], []>} : vector<256x256xbf16>, vector<256x128xbf16>, vector<256x128xf32> -> vector<256x128xf32>
    %10 = arith.addf %5, %9 : vector<256x128xf32>
    %c0_5 = arith.constant 0 : index
    %c0_6 = arith.constant 0 : index
    %11 = vector.load %arg6[%c0_5, %c0_6] : memref<256x128xf32, #tpu.memory_space<vmem>>, vector<256x128xf32>
    tpu.vector_store %arg6[%c0_5, %c0_6], %10 {strides = array<i32>} : memref<256x128xf32, #tpu.memory_space<vmem>>, vector<256x128xf32>,
    %c0_i32_7 = arith.constant 0 : i32
    %12 = arith.cmpi eq, %arg1, %c0_i32_7 : i32
    %13 = arith.extui %12 : i1 to i32
    %c0_i32_8 = arith.constant 0 : i32
    %14 = arith.cmpi ne, %13, %c0_i32_8 : i32
    scf.if %14 {
      %c0_9 = arith.constant 0 : index
      %c0_10 = arith.constant 0 : index
      %15 = vector.load %arg6[%c0_9, %c0_10] : memref<256x128xf32, #tpu.memory_space<vmem>>, vector<256x128xf32>
      %16 = arith.truncf %15 : vector<256x128xf32> to vector<256x128xbf16>
      %c0_11 = arith.constant 0 : index
      %c0_12 = arith.constant 0 : index
      %17 = vector.load %arg4[%c0_11, %c0_12] : memref<256x128xbf16, #tpu.memory_space<vmem>>, vector<256x128xbf16>
      tpu.vector_store %arg4[%c0_11, %c0_12], %16 {strides = array<i32>} : memref<256x128xbf16, #tpu.memory_space<vmem>>, vector<256x128xbf16>,
      %cst_13 = arith.constant dense<0.000000e+00> : vector<128xf32>
      %18 = vector.multi_reduction <add>, %15, %cst_13 [0] : vector<256x128xf32> to vector<128xf32>
      %19 = vector.shape_cast %18 : vector<128xf32> to vector<1x128xf32>
      %20 = arith.mulf %15, %15 : vector<256x128xf32>
      %cst_14 = arith.constant dense<0.000000e+00> : vector<128xf32>
      %21 = vector.multi_reduction <add>, %20, %cst_14 [0] : vector<256x128xf32> to vector<128xf32>
      %22 = vector.shape_cast %21 : vector<128xf32> to vector<1x128xf32>
      %23 = tpu.concatenate %19, %22 in 0 : vector<1x128xf32>, vector<1x128xf32> -> vector<2x128xf32>
      %24 = vector.shape_cast %23 : vector<2x128xf32> to vector<1x2x128xf32>
      %c0_15 = arith.constant 0 : index
      %c0_16 = arith.constant 0 : index
      %c0_17 = arith.constant 0 : index
      %25 = vector.load %arg5[%c0_15, %c0_16, %c0_17] : memref<1x2x128xf32, #tpu.memory_space<vmem>>, vector<1x2x128xf32>
      tpu.vector_store %arg5[%c0_15, %c0_16, %c0_17], %24 {strides = array<i32>} : memref<1x2x128xf32, #tpu.memory_space<vmem>>, vector<1x2x128xf32>,
    } else {
    }
    return
  }
  func.func @transform_0(%arg0: i32, %arg1: i32) -> (i32, i32) {
    %c0_i32 = arith.constant 0 : i32
    return %arg0, %arg1 : i32, i32
  }
  func.func @transform_1(%arg0: i32, %arg1: i32) -> (i32, i32) {
    %c0_i32 = arith.constant 0 : i32
    %c0_i32_0 = arith.constant 0 : i32
    %c0_i32_1 = arith.constant 0 : i32
    return %c0_i32, %c0_i32_0 : i32, i32
  }
  func.func @transform_2(%arg0: i32, %arg1: i32) -> (i32, i32) {
    %c0_i32 = arith.constant 0 : i32
    %c0_i32_0 = arith.constant 0 : i32
    return %arg0, %c0_i32 : i32, i32
  }
  func.func @transform_3(%arg0: i32, %arg1: i32) -> (i32, i32, i32) {
    %c0_i32 = arith.constant 0 : i32
    %c0_i32_0 = arith.constant 0 : i32
    %c0_i32_1 = arith.constant 0 : i32
    return %arg0, %c0_i32, %c0_i32_0 : i32, i32, i32
  }
}

module attributes {stable_mosaic.version = 11 : i64} {
  func.func @_residual_relu_kernel(%arg0: i32, %arg1: memref<512x128xbf16, #tpu.memory_space<vmem>>, %arg2: memref<1x128xf32, #tpu.memory_space<vmem>>, %arg3: memref<1x128xf32, #tpu.memory_space<vmem>>, %arg4: memref<512x128xbf16, #tpu.memory_space<vmem>>, %arg5: memref<1x128xf32, #tpu.memory_space<vmem>>, %arg6: memref<1x128xf32, #tpu.memory_space<vmem>>, %arg7: memref<512x128xf32, #tpu.memory_space<vmem>>) attributes {dimension_semantics = [#tpu.dimension_semantics<parallel>], iteration_bounds = array<i64: 1>, scalar_prefetch = 0 : i64, scratch_operands = 0 : i64, tpu.core_type = #tpu.core_type<tc>, window_params = [{transform_indices = @transform_0, window_bounds = array<i64: 512, 128>}, {pipeline_mode = #tpu.pipeline_mode<synchronous>, transform_indices = @transform_1, window_bounds = array<i64: 1, 128>}, {pipeline_mode = #tpu.pipeline_mode<synchronous>, transform_indices = @transform_2, window_bounds = array<i64: 1, 128>}, {transform_indices = @transform_3, window_bounds = array<i64: 512, 128>}, {pipeline_mode = #tpu.pipeline_mode<synchronous>, transform_indices = @transform_4, window_bounds = array<i64: 1, 128>}, {pipeline_mode = #tpu.pipeline_mode<synchronous>, transform_indices = @transform_5, window_bounds = array<i64: 1, 128>}, {transform_indices = @transform_6, window_bounds = array<i64: 512, 128>}]} {
    %c0 = arith.constant 0 : index
    %c0_0 = arith.constant 0 : index
    %0 = vector.load %arg1[%c0, %c0_0] : memref<512x128xbf16, #tpu.memory_space<vmem>>, vector<512x128xbf16>
    %1 = arith.extf %0 : vector<512x128xbf16> to vector<512x128xf32>
    %c0_1 = arith.constant 0 : index
    %c0_2 = arith.constant 0 : index
    %2 = vector.load %arg2[%c0_1, %c0_2] : memref<1x128xf32, #tpu.memory_space<vmem>>, vector<1x128xf32>
    %3 = vector.broadcast %2 : vector<1x128xf32> to vector<512x128xf32>
    %4 = arith.mulf %1, %3 : vector<512x128xf32>
    %c0_3 = arith.constant 0 : index
    %c0_4 = arith.constant 0 : index
    %5 = vector.load %arg3[%c0_3, %c0_4] : memref<1x128xf32, #tpu.memory_space<vmem>>, vector<1x128xf32>
    %6 = vector.broadcast %5 : vector<1x128xf32> to vector<512x128xf32>
    %7 = arith.addf %4, %6 : vector<512x128xf32>
    %c0_5 = arith.constant 0 : index
    %c0_6 = arith.constant 0 : index
    %8 = vector.load %arg4[%c0_5, %c0_6] : memref<512x128xbf16, #tpu.memory_space<vmem>>, vector<512x128xbf16>
    %9 = arith.extf %8 : vector<512x128xbf16> to vector<512x128xf32>
    %c0_7 = arith.constant 0 : index
    %c0_8 = arith.constant 0 : index
    %10 = vector.load %arg5[%c0_7, %c0_8] : memref<1x128xf32, #tpu.memory_space<vmem>>, vector<1x128xf32>
    %11 = vector.broadcast %10 : vector<1x128xf32> to vector<512x128xf32>
    %12 = arith.mulf %9, %11 : vector<512x128xf32>
    %13 = arith.addf %7, %12 : vector<512x128xf32>
    %c0_9 = arith.constant 0 : index
    %c0_10 = arith.constant 0 : index
    %14 = vector.load %arg6[%c0_9, %c0_10] : memref<1x128xf32, #tpu.memory_space<vmem>>, vector<1x128xf32>
    %15 = vector.broadcast %14 : vector<1x128xf32> to vector<512x128xf32>
    %16 = arith.addf %13, %15 : vector<512x128xf32>
    %cst = arith.constant 0.000000e+00 : f32
    %17 = vector.broadcast %cst : f32 to vector<512x128xf32>
    %18 = arith.maximumf %16, %17 : vector<512x128xf32>
    %c0_11 = arith.constant 0 : index
    %c0_12 = arith.constant 0 : index
    %19 = vector.load %arg7[%c0_11, %c0_12] : memref<512x128xf32, #tpu.memory_space<vmem>>, vector<512x128xf32>
    tpu.vector_store %arg7[%c0_11, %c0_12], %18 {strides = array<i32>} : memref<512x128xf32, #tpu.memory_space<vmem>>, vector<512x128xf32>,
    return
  }
  func.func @transform_0(%arg0: i32) -> (i32, i32) {
    %c0_i32 = arith.constant 0 : i32
    %c0_i32_0 = arith.constant 0 : i32
    return %arg0, %c0_i32 : i32, i32
  }
  func.func @transform_1(%arg0: i32) -> (i32, i32) {
    %c0_i32 = arith.constant 0 : i32
    %c0_i32_0 = arith.constant 0 : i32
    %c0_i32_1 = arith.constant 0 : i32
    return %c0_i32, %c0_i32_0 : i32, i32
  }
  func.func @transform_2(%arg0: i32) -> (i32, i32) {
    %c0_i32 = arith.constant 0 : i32
    %c0_i32_0 = arith.constant 0 : i32
    %c0_i32_1 = arith.constant 0 : i32
    return %c0_i32, %c0_i32_0 : i32, i32
  }
  func.func @transform_3(%arg0: i32) -> (i32, i32) {
    %c0_i32 = arith.constant 0 : i32
    %c0_i32_0 = arith.constant 0 : i32
    return %arg0, %c0_i32 : i32, i32
  }
  func.func @transform_4(%arg0: i32) -> (i32, i32) {
    %c0_i32 = arith.constant 0 : i32
    %c0_i32_0 = arith.constant 0 : i32
    %c0_i32_1 = arith.constant 0 : i32
    return %c0_i32, %c0_i32_0 : i32, i32
  }
  func.func @transform_5(%arg0: i32) -> (i32, i32) {
    %c0_i32 = arith.constant 0 : i32
    %c0_i32_0 = arith.constant 0 : i32
    %c0_i32_1 = arith.constant 0 : i32
    return %c0_i32, %c0_i32_0 : i32, i32
  }
  func.func @transform_6(%arg0: i32) -> (i32, i32) {
    %c0_i32 = arith.constant 0 : i32
    %c0_i32_0 = arith.constant 0 : i32
    return %arg0, %c0_i32 : i32, i32
  }
}

</mosaic_0001>

<bundles_post_ra>
// kernel: basic_block_forward.5
= control target key start
LH: loop header
LB: loop body
LE: loop exit
PB: predicated region body
PF: predicated region fallthrough
CT: control target
= control target key end

     0   :  { %s1800_s0 = inlined_call_operand.vmem [shape: bf16[512,128], index: 0, kind: input, shape index: {}]   ;;  %s1801_s1 = inlined_call_operand.vmem [shape: f32[1,128], index: 1, kind: input, shape index: {}]   ;;  %s1802_s2 = inlined_call_operand.vmem [shape: f32[1,128], index: 2, kind: input, shape index: {}]   ;;  %s1803_s3 = inlined_call_operand.vmem [shape: bf16[512,128], index: 3, kind: input, shape index: {}]   ;;  %s1804_s4 = inlined_call_operand.vmem [shape: f32[1,128], index: 4, kind: input, shape index: {}]   ;;  %s1805_s5 = inlined_call_operand.vmem [shape: f32[1,128], index: 5, kind: input, shape index: {}]   ;;  %s1806_s6 = inlined_call_operand.vmem [shape: f32[512,128], index: 6, kind: output, shape index: {}]  }
   0x1   :  { %v764_v0 = vld [vmem:[%s1800_s0] sm:$0xff]   ;;  %v1019_v9 = vld [vmem:[%s1800_s0 + $0x8] sm:$0xff]   ;;  %v1020_v15 = vld [vmem:[%s1800_s0 + $0x10] sm:$0xff]  }
   0x2   :  { %v1126_v1 = vld [vmem:[%s1801_s1] ss:$0 sm:$0xff]  ;;  %v765_v2 = vunpack.c.l.bf16 %v764_v0  ;;  %v766_v5 = vunpack.c.h.bf16 %v764_v0  ;;  %v1050_v10 = vld [vmem:[%s1803_s3 + $0x8] sm:$0xff]   ;;  %v769_v13 = vunpack.c.l.bf16 %v1019_v9  ;;  %v1051_v16 = vld [vmem:[%s1803_s3 + $0x10] sm:$0xff]   ;;  %v770_v19 = vunpack.c.h.bf16 %v1019_v9 }
   0x3   :  { %v892_v3 = vld [vmem:[%s1803_s3] sm:$0xff]   ;;  %v897_v14 = vunpack.c.l.bf16 %v1050_v10  ;;  %v898_v20 = vunpack.c.h.bf16 %v1050_v10  ;;  %v773_v28 = vunpack.c.l.bf16 %v1020_v15  ;;  %v901_v29 = vunpack.c.l.bf16 %v1051_v16  ;;  %v1021_v34 = vld [vmem:[%s1800_s0 + $0x18] sm:$0xff]   ;;  %v1023_v9 = vld [vmem:[%s1800_s0 + $0x28] sm:$0xff]  }
   0x4   :  { %v1134_v4 = vld [vmem:[%s1804_s4] ss:$0 sm:$0xff]  ;;  %v893_v7 = vunpack.c.l.bf16 %v892_v3  ;;  %v894_v8 = vunpack.c.h.bf16 %v892_v3  ;;  %v158_v11 = vmul.f32 %v765_v2, %v1126_v1  ;;  %v159_v12 = vmul.f32 %v766_v5, %v1126_v1  ;;  %v1052_v43 = vld [vmem:[%s1803_s3 + $0x18] sm:$0xff]  }
   0x5   :  { %v1139_v6 = vld [vmem:[%s1802_s2] ss:$0 sm:$0xff]  ;;  %v160_v23 = vmul.f32 %v769_v13, %v1126_v1  ;;  %v430_v24 = vmul.f32 %v897_v14, %v1134_v4  ;;  %v161_v26 = vmul.f32 %v770_v19, %v1126_v1  ;;  %v431_v27 = vmul.f32 %v898_v20, %v1134_v4  ;;  %v1054_v14 = vld [vmem:[%s1803_s3 + $0x28] sm:$0xff]  }
   0x6   :  { %v428_v17 = vmul.f32 %v893_v7, %v1134_v4  ;;  %v429_v18 = vmul.f32 %v894_v8, %v1134_v4  ;;  %v229_v21 = vadd.f32 %v1139_v6, %v158_v11  ;;  %v230_v22 = vadd.f32 %v1139_v6, %v159_v12  ;;  %v1164_v25 = vld [vmem:[%s1805_s5] ss:$0 sm:$0xff] }
   0x7   :  { %v231_v32 = vadd.f32 %v1139_v6, %v160_v23  ;;  %v774_v33 = vunpack.c.h.bf16 %v1020_v15  ;;  %v232_v35 = vadd.f32 %v1139_v6, %v161_v26  ;;  %v162_v36 = vmul.f32 %v773_v28, %v1126_v1  ;;  %v1022_v56 = vld [vmem:[%s1800_s0 + $0x20] sm:$0xff]   ;;  %v1024_v28 = vld [vmem:[%s1800_s0 + $0x30] sm:$0xff]  }
   0x8   :  { %v492_v30 = vadd.f32 %v428_v17, %v229_v21  ;;  %v493_v31 = vadd.f32 %v429_v18, %v230_v22  ;;  %v432_v37 = vmul.f32 %v901_v29, %v1134_v4  ;;  %v902_v38 = vunpack.c.h.bf16 %v1051_v16  ;;  %v1053_v61 = vld [vmem:[%s1803_s3 + $0x20] sm:$0xff]  }
   0x9   :  { %v494_v41 = vadd.f32 %v430_v24, %v231_v32  ;;  %v163_v42 = vmul.f32 %v774_v33, %v1126_v1  ;;  %v495_v44 = vadd.f32 %v431_v27, %v232_v35  ;;  %v233_v45 = vadd.f32 %v1139_v6, %v162_v36  ;;  %v1055_v33 = vld [vmem:[%s1803_s3 + $0x30] sm:$0xff]  }
   0xa   :  { %v563_v39 = vadd.f32 %v1164_v25, %v492_v30  ;;  %v564_v40 = vadd.f32 %v1164_v25, %v493_v31  ;;  %v433_v46 = vmul.f32 %v902_v38, %v1134_v4  ;;  %v777_v47 = vunpack.c.l.bf16 %v1021_v34 }
   0xb   :  { %v565_v50 = vadd.f32 %v1164_v25, %v494_v41  ;;  %v234_v51 = vadd.f32 %v1139_v6, %v163_v42  ;;  %v566_v52 = vadd.f32 %v1164_v25, %v495_v44  ;;  %v496_v53 = vadd.f32 %v432_v37, %v233_v45 }
   0xc   :  { %v627_v48 = vmax.f32 %v563_v39, 0.0  ;;  %v628_v49 = vmax.f32 %v564_v40, 0.0  ;;  %v164_v54 = vmul.f32 %v777_v47, %v1126_v1  ;;  %v905_v55 = vunpack.c.l.bf16 %v1052_v43 }
   0xd   :  { %v629_v57 = vmax.f32 %v565_v50, 0.0  ;;  %v497_v58 = vadd.f32 %v433_v46, %v234_v51  ;;  %v778_v59 = vunpack.c.h.bf16 %v1021_v34  ;;  %v906_v60 = vunpack.c.h.bf16 %v1052_v43  ;;  %v1025_v50 = vld [vmem:[%s1800_s0 + $0x38] sm:$0xff]  }
   0xe   :  { %691 = vst [vmem:[%s1806_s6] sm:$0xff] %v627_v48  ;;  %692 = vst [vmem:[%s1806_s6 + $0x8] sm:$0xff] %v628_v49  ;;  %v630_v62 = vmax.f32 %v566_v52, 0.0  ;;  %v567_v63 = vadd.f32 %v1164_v25, %v496_v53  ;;  %v235_v0 = vadd.f32 %v1139_v6, %v164_v54  ;;  %v434_v2 = vmul.f32 %v905_v55, %v1134_v4  ;;  %v1056_v51 = vld [vmem:[%s1803_s3 + $0x38] sm:$0xff]  }
   0xf   :  { %693 = vst [vmem:[%s1806_s6 + $0x10] sm:$0xff] %v629_v57  ;;  %v568_v3 = vadd.f32 %v1164_v25, %v497_v58  ;;  %v165_v5 = vmul.f32 %v778_v59, %v1126_v1  ;;  %v435_v7 = vmul.f32 %v906_v60, %v1134_v4  ;;  %v781_v8 = vunpack.c.l.bf16 %v1022_v56 }
  0x10   :  { %694 = vst [vmem:[%s1806_s6 + $0x18] sm:$0xff] %v630_v62  ;;  %v631_v10 = vmax.f32 %v567_v63, 0.0  ;;  %v498_v11 = vadd.f32 %v434_v2, %v235_v0  ;;  %v909_v12 = vunpack.c.l.bf16 %v1053_v61  ;;  %v782_v13 = vunpack.c.h.bf16 %v1022_v56  ;;  %v1026_v0 = vld [vmem:[%s1800_s0 + $0x40] sm:$0xff]  }
  0x11   :  { %v632_v15 = vmax.f32 %v568_v3, 0.0  ;;  %v236_v16 = vadd.f32 %v1139_v6, %v165_v5  ;;  %v166_v17 = vmul.f32 %v781_v8, %v1126_v1  ;;  %v910_v18 = vunpack.c.h.bf16 %v1053_v61  ;;  %v1057_v8 = vld [vmem:[%s1803_s3 + $0x40] sm:$0xff]  }
  0x12   :  { %695 = vst [vmem:[%s1806_s6 + $0x20] sm:$0xff] %v631_v10  ;;  %v569_v19 = vadd.f32 %v1164_v25, %v498_v11  ;;  %v436_v20 = vmul.f32 %v909_v12, %v1134_v4  ;;  %v167_v21 = vmul.f32 %v782_v13, %v1126_v1  ;;  %v785_v22 = vunpack.c.l.bf16 %v1023_v9 }
  0x13   :  { %696 = vst [vmem:[%s1806_s6 + $0x28] sm:$0xff] %v632_v15  ;;  %v499_v23 = vadd.f32 %v435_v7, %v236_v16  ;;  %v237_v24 = vadd.f32 %v1139_v6, %v166_v17  ;;  %v437_v26 = vmul.f32 %v910_v18, %v1134_v4  ;;  %v913_v27 = vunpack.c.l.bf16 %v1054_v14 }
  0x14   :  { %v633_v29 = vmax.f32 %v569_v19, 0.0  ;;  %v238_v30 = vadd.f32 %v1139_v6, %v167_v21  ;;  %v168_v31 = vmul.f32 %v785_v22, %v1126_v1  ;;  %v786_v32 = vunpack.c.h.bf16 %v1023_v9  ;;  %v1027_v21 = vld [vmem:[%s1800_s0 + $0x48] sm:$0xff]  }
  0x15   :  { %v570_v34 = vadd.f32 %v1164_v25, %v499_v23  ;;  %v500_v35 = vadd.f32 %v436_v20, %v237_v24  ;;  %v438_v36 = vmul.f32 %v913_v27, %v1134_v4  ;;  %v914_v37 = vunpack.c.h.bf16 %v1054_v14  ;;  %v1058_v27 = vld [vmem:[%s1803_s3 + $0x48] sm:$0xff]  }
  0x16   :  { %697 = vst [vmem:[%s1806_s6 + $0x30] sm:$0xff] %v633_v29  ;;  %v501_v38 = vadd.f32 %v437_v26, %v238_v30  ;;  %v239_v39 = vadd.f32 %v1139_v6, %v168_v31  ;;  %v169_v40 = vmul.f32 %v786_v32, %v1126_v1  ;;  %v789_v41 = vunpack.c.l.bf16 %v1024_v28 }
  0x17   :  { %v634_v42 = vmax.f32 %v570_v34, 0.0  ;;  %v571_v43 = vadd.f32 %v1164_v25, %v500_v35  ;;  %v439_v44 = vmul.f32 %v914_v37, %v1134_v4  ;;  %v917_v45 = vunpack.c.l.bf16 %v1055_v33 }
  0x18   :  { %v572_v46 = vadd.f32 %v1164_v25, %v501_v38  ;;  %v502_v47 = vadd.f32 %v438_v36, %v239_v39  ;;  %v240_v48 = vadd.f32 %v1139_v6, %v169_v40  ;;  %v170_v49 = vmul.f32 %v789_v41, %v1126_v1 }
  0x19   :  { %698 = vst [vmem:[%s1806_s6 + $0x38] sm:$0xff] %v634_v42  ;;  %v635_v52 = vmax.f32 %v571_v43, 0.0  ;;  %v440_v53 = vmul.f32 %v917_v45, %v1134_v4  ;;  %v790_v54 = vunpack.c.h.bf16 %v1024_v28  ;;  %v918_v55 = vunpack.c.h.bf16 %v1055_v33  ;;  %v1059_v45 = vld [vmem:[%s1803_s3 + $0x50] sm:$0xff]  }
  0x1a   :  { %v636_v56 = vmax.f32 %v572_v46, 0.0  ;;  %v573_v57 = vadd.f32 %v1164_v25, %v502_v47  ;;  %v503_v58 = vadd.f32 %v439_v44, %v240_v48  ;;  %v241_v59 = vadd.f32 %v1139_v6, %v170_v49  ;;  %v1028_v44 = vld [vmem:[%s1800_s0 + $0x50] sm:$0xff]  }
  0x1b   :  { %699 = vst [vmem:[%s1806_s6 + $0x40] sm:$0xff] %v635_v52  ;;  %v171_v60 = vmul.f32 %v790_v54, %v1126_v1  ;;  %v441_v61 = vmul.f32 %v918_v55, %v1134_v4  ;;  %v793_v62 = vunpack.c.l.bf16 %v1025_v50  ;;  %v921_v63 = vunpack.c.l.bf16 %v1056_v51 }
  0x1c   :  { %700 = vst [vmem:[%s1806_s6 + $0x48] sm:$0xff] %v636_v56  ;;  %v637_v2 = vmax.f32 %v573_v57, 0.0  ;;  %v574_v3 = vadd.f32 %v1164_v25, %v503_v58  ;;  %v504_v5 = vadd.f32 %v440_v53, %v241_v59  ;;  %v794_v7 = vunpack.c.h.bf16 %v1025_v50  ;;  %v1029_v58 = vld [vmem:[%s1800_s0 + $0x58] sm:$0xff]  }
  0x1d   :  { %v242_v9 = vadd.f32 %v1139_v6, %v171_v60  ;;  %v172_v10 = vmul.f32 %v793_v62, %v1126_v1  ;;  %v442_v11 = vmul.f32 %v921_v63, %v1134_v4  ;;  %v922_v12 = vunpack.c.h.bf16 %v1056_v51  ;;  %v1060_v63 = vld [vmem:[%s1803_s3 + $0x58] sm:$0xff]  }
  0x1e   :  { %701 = vst [vmem:[%s1806_s6 + $0x50] sm:$0xff] %v637_v2  ;;  %v638_v13 = vmax.f32 %v574_v3, 0.0  ;;  %v575_v14 = vadd.f32 %v1164_v25, %v504_v5  ;;  %v173_v15 = vmul.f32 %v794_v7, %v1126_v1  ;;  %v797_v16 = vunpack.c.l.bf16 %v1026_v0 }
  0x1f   :  { %v505_v17 = vadd.f32 %v441_v61, %v242_v9  ;;  %v243_v18 = vadd.f32 %v1139_v6, %v172_v10  ;;  %v443_v19 = vmul.f32 %v922_v12, %v1134_v4  ;;  %v925_v20 = vunpack.c.l.bf16 %v1057_v8 }
  0x20   :  { %702 = vst [vmem:[%s1806_s6 + $0x58] sm:$0xff] %v638_v13  ;;  %v639_v22 = vmax.f32 %v575_v14, 0.0  ;;  %v244_v23 = vadd.f32 %v1139_v6, %v173_v15  ;;  %v174_v24 = vmul.f32 %v797_v16, %v1126_v1  ;;  %v798_v26 = vunpack.c.h.bf16 %v1026_v0  ;;  %v1030_v15 = vld [vmem:[%s1800_s0 + $0x60] sm:$0xff]  }
  0x21   :  { %v576_v28 = vadd.f32 %v1164_v25, %v505_v17  ;;  %v506_v29 = vadd.f32 %v442_v11, %v243_v18  ;;  %v444_v30 = vmul.f32 %v925_v20, %v1134_v4  ;;  %v926_v31 = vunpack.c.h.bf16 %v1057_v8  ;;  %v1061_v20 = vld [vmem:[%s1803_s3 + $0x60] sm:$0xff]  }
  0x22   :  { %703 = vst [vmem:[%s1806_s6 + $0x60] sm:$0xff] %v639_v22  ;;  %v507_v32 = vadd.f32 %v443_v19, %v244_v23  ;;  %v245_v33 = vadd.f32 %v1139_v6, %v174_v24  ;;  %v175_v34 = vmul.f32 %v798_v26, %v1126_v1  ;;  %v801_v35 = vunpack.c.l.bf16 %v1027_v21 }
  0x23   :  { %v640_v36 = vmax.f32 %v576_v28, 0.0  ;;  %v577_v37 = vadd.f32 %v1164_v25, %v506_v29  ;;  %v445_v38 = vmul.f32 %v926_v31, %v1134_v4  ;;  %v929_v39 = vunpack.c.l.bf16 %v1058_v27 }
  0x24   :  { %v578_v40 = vadd.f32 %v1164_v25, %v507_v32  ;;  %v508_v41 = vadd.f32 %v444_v30, %v245_v33  ;;  %v246_v42 = vadd.f32 %v1139_v6, %v175_v34  ;;  %v176_v43 = vmul.f32 %v801_v35, %v1126_v1 }
  0x25   :  { %704 = vst [vmem:[%s1806_s6 + $0x68] sm:$0xff] %v640_v36  ;;  %v641_v46 = vmax.f32 %v577_v37, 0.0  ;;  %v446_v47 = vmul.f32 %v929_v39, %v1134_v4  ;;  %v802_v48 = vunpack.c.h.bf16 %v1027_v21  ;;  %v930_v49 = vunpack.c.h.bf16 %v1058_v27  ;;  %v1062_v39 = vld [vmem:[%s1803_s3 + $0x68] sm:$0xff]  }
  0x26   :  { %v642_v50 = vmax.f32 %v578_v40, 0.0  ;;  %v579_v51 = vadd.f32 %v1164_v25, %v508_v41  ;;  %v509_v52 = vadd.f32 %v445_v38, %v246_v42  ;;  %v247_v53 = vadd.f32 %v1139_v6, %v176_v43  ;;  %v1031_v38 = vld [vmem:[%s1800_s0 + $0x68] sm:$0xff]  }
  0x27   :  { %705 = vst [vmem:[%s1806_s6 + $0x70] sm:$0xff] %v641_v46  ;;  %v177_v54 = vmul.f32 %v802_v48, %v1126_v1  ;;  %v447_v55 = vmul.f32 %v930_v49, %v1134_v4  ;;  %v805_v56 = vunpack.c.l.bf16 %v1028_v44  ;;  %v933_v57 = vunpack.c.l.bf16 %v1059_v45 }
  0x28   :  { %706 = vst [vmem:[%s1806_s6 + $0x78] sm:$0xff] %v642_v50  ;;  %v643_v59 = vmax.f32 %v579_v51, 0.0  ;;  %v580_v60 = vadd.f32 %v1164_v25, %v509_v52  ;;  %v510_v61 = vadd.f32 %v446_v47, %v247_v53  ;;  %v806_v62 = vunpack.c.h.bf16 %v1028_v44  ;;  %v1032_v52 = vld [vmem:[%s1800_s0 + $0x70] sm:$0xff]  }
  0x29   :  { %v248_v0 = vadd.f32 %v1139_v6, %v177_v54  ;;  %v178_v2 = vmul.f32 %v805_v56, %v1126_v1  ;;  %v448_v3 = vmul.f32 %v933_v57, %v1134_v4  ;;  %v934_v5 = vunpack.c.h.bf16 %v1059_v45  ;;  %v1063_v57 = vld [vmem:[%s1803_s3 + $0x70] sm:$0xff]  }
  0x2a   :  { %707 = vst [vmem:[%s1806_s6 + $0x80] sm:$0xff] %v643_v59  ;;  %v644_v7 = vmax.f32 %v580_v60, 0.0  ;;  %v581_v8 = vadd.f32 %v1164_v25, %v510_v61  ;;  %v179_v9 = vmul.f32 %v806_v62, %v1126_v1  ;;  %v809_v10 = vunpack.c.l.bf16 %v1029_v58 }
  0x2b   :  { %v511_v11 = vadd.f32 %v447_v55, %v248_v0  ;;  %v249_v12 = vadd.f32 %v1139_v6, %v178_v2  ;;  %v449_v13 = vmul.f32 %v934_v5, %v1134_v4  ;;  %v937_v14 = vunpack.c.l.bf16 %v1060_v63 }
  0x2c   :  { %708 = vst [vmem:[%s1806_s6 + $0x88] sm:$0xff] %v644_v7  ;;  %v645_v16 = vmax.f32 %v581_v8, 0.0  ;;  %v250_v17 = vadd.f32 %v1139_v6, %v179_v9  ;;  %v180_v18 = vmul.f32 %v809_v10, %v1126_v1  ;;  %v810_v19 = vunpack.c.h.bf16 %v1029_v58  ;;  %v1033_v9 = vld [vmem:[%s1800_s0 + $0x78] sm:$0xff]  }
  0x2d   :  { %v582_v21 = vadd.f32 %v1164_v25, %v511_v11  ;;  %v512_v22 = vadd.f32 %v448_v3, %v249_v12  ;;  %v450_v23 = vmul.f32 %v937_v14, %v1134_v4  ;;  %v938_v24 = vunpack.c.h.bf16 %v1060_v63  ;;  %v1064_v14 = vld [vmem:[%s1803_s3 + $0x78] sm:$0xff]  }
  0x2e   :  { %709 = vst [vmem:[%s1806_s6 + $0x90] sm:$0xff] %v645_v16  ;;  %v513_v26 = vadd.f32 %v449_v13, %v250_v17  ;;  %v251_v27 = vadd.f32 %v1139_v6, %v180_v18  ;;  %v181_v28 = vmul.f32 %v810_v19, %v1126_v1  ;;  %v813_v29 = vunpack.c.l.bf16 %v1030_v15 }
  0x2f   :  { %v646_v30 = vmax.f32 %v582_v21, 0.0  ;;  %v583_v31 = vadd.f32 %v1164_v25, %v512_v22  ;;  %v451_v32 = vmul.f32 %v938_v24, %v1134_v4  ;;  %v941_v33 = vunpack.c.l.bf16 %v1061_v20 }
  0x30   :  { %v584_v34 = vadd.f32 %v1164_v25, %v513_v26  ;;  %v514_v35 = vadd.f32 %v450_v23, %v251_v27  ;;  %v252_v36 = vadd.f32 %v1139_v6, %v181_v28  ;;  %v182_v37 = vmul.f32 %v813_v29, %v1126_v1 }
  0x31   :  { %710 = vst [vmem:[%s1806_s6 + $0x98] sm:$0xff] %v646_v30  ;;  %v647_v40 = vmax.f32 %v583_v31, 0.0  ;;  %v452_v41 = vmul.f32 %v941_v33, %v1134_v4  ;;  %v814_v42 = vunpack.c.h.bf16 %v1030_v15  ;;  %v942_v43 = vunpack.c.h.bf16 %v1061_v20  ;;  %v1065_v33 = vld [vmem:[%s1803_s3 + $0x80] sm:$0xff]  }
  0x32   :  { %v648_v44 = vmax.f32 %v584_v34, 0.0  ;;  %v585_v45 = vadd.f32 %v1164_v25, %v514_v35  ;;  %v515_v46 = vadd.f32 %v451_v32, %v252_v36  ;;  %v253_v47 = vadd.f32 %v1139_v6, %v182_v37  ;;  %v1034_v32 = vld [vmem:[%s1800_s0 + $0x80] sm:$0xff]  }
  0x33   :  { %711 = vst [vmem:[%s1806_s6 + $0xa0] sm:$0xff] %v647_v40  ;;  %v183_v48 = vmul.f32 %v814_v42, %v1126_v1  ;;  %v453_v49 = vmul.f32 %v942_v43, %v1134_v4  ;;  %v817_v50 = vunpack.c.l.bf16 %v1031_v38  ;;  %v945_v51 = vunpack.c.l.bf16 %v1062_v39 }
  0x34   :  { %712 = vst [vmem:[%s1806_s6 + $0xa8] sm:$0xff] %v648_v44  ;;  %v649_v53 = vmax.f32 %v585_v45, 0.0  ;;  %v586_v54 = vadd.f32 %v1164_v25, %v515_v46  ;;  %v516_v55 = vadd.f32 %v452_v41, %v253_v47  ;;  %v818_v56 = vunpack.c.h.bf16 %v1031_v38  ;;  %v1035_v46 = vld [vmem:[%s1800_s0 + $0x88] sm:$0xff]  }
  0x35   :  { %v254_v58 = vadd.f32 %v1139_v6, %v183_v48  ;;  %v184_v59 = vmul.f32 %v817_v50, %v1126_v1  ;;  %v454_v60 = vmul.f32 %v945_v51, %v1134_v4  ;;  %v946_v61 = vunpack.c.h.bf16 %v1062_v39  ;;  %v1066_v51 = vld [vmem:[%s1803_s3 + $0x88] sm:$0xff]  }
  0x36   :  { %713 = vst [vmem:[%s1806_s6 + $0xb0] sm:$0xff] %v649_v53  ;;  %v650_v62 = vmax.f32 %v586_v54, 0.0  ;;  %v587_v63 = vadd.f32 %v1164_v25, %v516_v55  ;;  %v185_v0 = vmul.f32 %v818_v56, %v1126_v1  ;;  %v821_v2 = vunpack.c.l.bf16 %v1032_v52 }
  0x37   :  { %v517_v3 = vadd.f32 %v453_v49, %v254_v58  ;;  %v255_v5 = vadd.f32 %v1139_v6, %v184_v59  ;;  %v455_v7 = vmul.f32 %v946_v61, %v1134_v4  ;;  %v949_v8 = vunpack.c.l.bf16 %v1063_v57 }
  0x38   :  { %714 = vst [vmem:[%s1806_s6 + $0xb8] sm:$0xff] %v650_v62  ;;  %v651_v10 = vmax.f32 %v587_v63, 0.0  ;;  %v256_v11 = vadd.f32 %v1139_v6, %v185_v0  ;;  %v186_v12 = vmul.f32 %v821_v2, %v1126_v1  ;;  %v822_v13 = vunpack.c.h.bf16 %v1032_v52  ;;  %v1036_v0 = vld [vmem:[%s1800_s0 + $0x90] sm:$0xff]  }
  0x39   :  { %v588_v15 = vadd.f32 %v1164_v25, %v517_v3  ;;  %v518_v16 = vadd.f32 %v454_v60, %v255_v5  ;;  %v456_v17 = vmul.f32 %v949_v8, %v1134_v4  ;;  %v950_v18 = vunpack.c.h.bf16 %v1063_v57  ;;  %v1067_v8 = vld [vmem:[%s1803_s3 + $0x90] sm:$0xff]  }
  0x3a   :  { %715 = vst [vmem:[%s1806_s6 + $0xc0] sm:$0xff] %v651_v10  ;;  %v519_v19 = vadd.f32 %v455_v7, %v256_v11  ;;  %v257_v20 = vadd.f32 %v1139_v6, %v186_v12  ;;  %v187_v21 = vmul.f32 %v822_v13, %v1126_v1  ;;  %v825_v22 = vunpack.c.l.bf16 %v1033_v9 }
  0x3b   :  { %v652_v23 = vmax.f32 %v588_v15, 0.0  ;;  %v589_v24 = vadd.f32 %v1164_v25, %v518_v16  ;;  %v457_v26 = vmul.f32 %v950_v18, %v1134_v4  ;;  %v953_v27 = vunpack.c.l.bf16 %v1064_v14 }
  0x3c   :  { %v590_v28 = vadd.f32 %v1164_v25, %v519_v19  ;;  %v520_v29 = vadd.f32 %v456_v17, %v257_v20  ;;  %v258_v30 = vadd.f32 %v1139_v6, %v187_v21  ;;  %v188_v31 = vmul.f32 %v825_v22, %v1126_v1 }
  0x3d   :  { %716 = vst [vmem:[%s1806_s6 + $0xc8] sm:$0xff] %v652_v23  ;;  %v653_v34 = vmax.f32 %v589_v24, 0.0  ;;  %v458_v35 = vmul.f32 %v953_v27, %v1134_v4  ;;  %v826_v36 = vunpack.c.h.bf16 %v1033_v9  ;;  %v954_v37 = vunpack.c.h.bf16 %v1064_v14  ;;  %v1068_v27 = vld [vmem:[%s1803_s3 + $0x98] sm:$0xff]  }
  0x3e   :  { %v654_v38 = vmax.f32 %v590_v28, 0.0  ;;  %v591_v39 = vadd.f32 %v1164_v25, %v520_v29  ;;  %v521_v40 = vadd.f32 %v457_v26, %v258_v30  ;;  %v259_v41 = vadd.f32 %v1139_v6, %v188_v31  ;;  %v1037_v26 = vld [vmem:[%s1800_s0 + $0x98] sm:$0xff]  }
  0x3f   :  { %717 = vst [vmem:[%s1806_s6 + $0xd0] sm:$0xff] %v653_v34  ;;  %v189_v42 = vmul.f32 %v826_v36, %v1126_v1  ;;  %v459_v43 = vmul.f32 %v954_v37, %v1134_v4  ;;  %v829_v44 = vunpack.c.l.bf16 %v1034_v32  ;;  %v957_v45 = vunpack.c.l.bf16 %v1065_v33 }
  0x40   :  { %718 = vst [vmem:[%s1806_s6 + $0xd8] sm:$0xff] %v654_v38  ;;  %v655_v47 = vmax.f32 %v591_v39, 0.0  ;;  %v592_v48 = vadd.f32 %v1164_v25, %v521_v40  ;;  %v522_v49 = vadd.f32 %v458_v35, %v259_v41  ;;  %v830_v50 = vunpack.c.h.bf16 %v1034_v32  ;;  %v1038_v40 = vld [vmem:[%s1800_s0 + $0xa0] sm:$0xff]  }
  0x41   :  { %v260_v52 = vadd.f32 %v1139_v6, %v189_v42  ;;  %v190_v53 = vmul.f32 %v829_v44, %v1126_v1  ;;  %v460_v54 = vmul.f32 %v957_v45, %v1134_v4  ;;  %v958_v55 = vunpack.c.h.bf16 %v1065_v33  ;;  %v1069_v45 = vld [vmem:[%s1803_s3 + $0xa0] sm:$0xff]  }
  0x42   :  { %719 = vst [vmem:[%s1806_s6 + $0xe0] sm:$0xff] %v655_v47  ;;  %v656_v56 = vmax.f32 %v592_v48, 0.0  ;;  %v593_v57 = vadd.f32 %v1164_v25, %v522_v49  ;;  %v191_v58 = vmul.f32 %v830_v50, %v1126_v1  ;;  %v833_v59 = vunpack.c.l.bf16 %v1035_v46 }
  0x43   :  { %v523_v60 = vadd.f32 %v459_v43, %v260_v52  ;;  %v261_v61 = vadd.f32 %v1139_v6, %v190_v53  ;;  %v461_v62 = vmul.f32 %v958_v55, %v1134_v4  ;;  %v961_v63 = vunpack.c.l.bf16 %v1066_v51 }
  0x44   :  { %720 = vst [vmem:[%s1806_s6 + $0xe8] sm:$0xff] %v656_v56  ;;  %v657_v2 = vmax.f32 %v593_v57, 0.0  ;;  %v262_v3 = vadd.f32 %v1139_v6, %v191_v58  ;;  %v192_v5 = vmul.f32 %v833_v59, %v1126_v1  ;;  %v834_v7 = vunpack.c.h.bf16 %v1035_v46  ;;  %v1039_v58 = vld [vmem:[%s1800_s0 + $0xa8] sm:$0xff]  }
  0x45   :  { %v594_v9 = vadd.f32 %v1164_v25, %v523_v60  ;;  %v524_v10 = vadd.f32 %v460_v54, %v261_v61  ;;  %v462_v11 = vmul.f32 %v961_v63, %v1134_v4  ;;  %v962_v12 = vunpack.c.h.bf16 %v1066_v51  ;;  %v1070_v63 = vld [vmem:[%s1803_s3 + $0xa8] sm:$0xff]  }
  0x46   :  { %721 = vst [vmem:[%s1806_s6 + $0xf0] sm:$0xff] %v657_v2  ;;  %v525_v13 = vadd.f32 %v461_v62, %v262_v3  ;;  %v263_v14 = vadd.f32 %v1139_v6, %v192_v5  ;;  %v193_v15 = vmul.f32 %v834_v7, %v1126_v1  ;;  %v837_v16 = vunpack.c.l.bf16 %v1036_v0 }
  0x47   :  { %v658_v17 = vmax.f32 %v594_v9, 0.0  ;;  %v595_v18 = vadd.f32 %v1164_v25, %v524_v10  ;;  %v463_v19 = vmul.f32 %v962_v12, %v1134_v4  ;;  %v965_v20 = vunpack.c.l.bf16 %v1067_v8 }
  0x48   :  { %v596_v21 = vadd.f32 %v1164_v25, %v525_v13  ;;  %v526_v22 = vadd.f32 %v462_v11, %v263_v14  ;;  %v264_v23 = vadd.f32 %v1139_v6, %v193_v15  ;;  %v194_v24 = vmul.f32 %v837_v16, %v1126_v1 }
  0x49   :  { %722 = vst [vmem:[%s1806_s6 + $0xf8] sm:$0xff] %v658_v17  ;;  %v659_v28 = vmax.f32 %v595_v18, 0.0  ;;  %v464_v29 = vmul.f32 %v965_v20, %v1134_v4  ;;  %v838_v30 = vunpack.c.h.bf16 %v1036_v0  ;;  %v966_v31 = vunpack.c.h.bf16 %v1067_v8  ;;  %v1071_v20 = vld [vmem:[%s1803_s3 + $0xb0] sm:$0xff]  }
  0x4a   :  { %v660_v32 = vmax.f32 %v596_v21, 0.0  ;;  %v597_v33 = vadd.f32 %v1164_v25, %v526_v22  ;;  %v527_v34 = vadd.f32 %v463_v19, %v264_v23  ;;  %v265_v35 = vadd.f32 %v1139_v6, %v194_v24  ;;  %v1040_v19 = vld [vmem:[%s1800_s0 + $0xb0] sm:$0xff]  }
  0x4b   :  { %723 = vst [vmem:[%s1806_s6 + $0x100] sm:$0xff] %v659_v28  ;;  %v195_v36 = vmul.f32 %v838_v30, %v1126_v1  ;;  %v465_v37 = vmul.f32 %v966_v31, %v1134_v4  ;;  %v841_v38 = vunpack.c.l.bf16 %v1037_v26  ;;  %v969_v39 = vunpack.c.l.bf16 %v1068_v27 }
  0x4c   :  { %724 = vst [vmem:[%s1806_s6 + $0x108] sm:$0xff] %v660_v32  ;;  %v661_v41 = vmax.f32 %v597_v33, 0.0  ;;  %v598_v42 = vadd.f32 %v1164_v25, %v527_v34  ;;  %v528_v43 = vadd.f32 %v464_v29, %v265_v35  ;;  %v842_v44 = vunpack.c.h.bf16 %v1037_v26  ;;  %v1041_v34 = vld [vmem:[%s1800_s0 + $0xb8] sm:$0xff]  }
  0x4d   :  { %v266_v46 = vadd.f32 %v1139_v6, %v195_v36  ;;  %v196_v47 = vmul.f32 %v841_v38, %v1126_v1  ;;  %v466_v48 = vmul.f32 %v969_v39, %v1134_v4  ;;  %v970_v49 = vunpack.c.h.bf16 %v1068_v27  ;;  %v1072_v39 = vld [vmem:[%s1803_s3 + $0xb8] sm:$0xff]  }
  0x4e   :  { %725 = vst [vmem:[%s1806_s6 + $0x110] sm:$0xff] %v661_v41  ;;  %v662_v50 = vmax.f32 %v598_v42, 0.0  ;;  %v599_v51 = vadd.f32 %v1164_v25, %v528_v43  ;;  %v197_v52 = vmul.f32 %v842_v44, %v1126_v1  ;;  %v845_v53 = vunpack.c.l.bf16 %v1038_v40 }
  0x4f   :  { %v529_v54 = vadd.f32 %v465_v37, %v266_v46  ;;  %v267_v55 = vadd.f32 %v1139_v6, %v196_v47  ;;  %v467_v56 = vmul.f32 %v970_v49, %v1134_v4  ;;  %v973_v57 = vunpack.c.l.bf16 %v1069_v45 }
  0x50   :  { %726 = vst [vmem:[%s1806_s6 + $0x118] sm:$0xff] %v662_v50  ;;  %v663_v59 = vmax.f32 %v599_v51, 0.0  ;;  %v268_v60 = vadd.f32 %v1139_v6, %v197_v52  ;;  %v198_v61 = vmul.f32 %v845_v53, %v1126_v1  ;;  %v846_v62 = vunpack.c.h.bf16 %v1038_v40  ;;  %v1042_v52 = vld [vmem:[%s1800_s0 + $0xc0] sm:$0xff]  }
  0x51   :  { %v600_v0 = vadd.f32 %v1164_v25, %v529_v54  ;;  %v530_v2 = vadd.f32 %v466_v48, %v267_v55  ;;  %v468_v3 = vmul.f32 %v973_v57, %v1134_v4  ;;  %v974_v5 = vunpack.c.h.bf16 %v1069_v45  ;;  %v1073_v57 = vld [vmem:[%s1803_s3 + $0xc0] sm:$0xff]  }
  0x52   :  { %727 = vst [vmem:[%s1806_s6 + $0x120] sm:$0xff] %v663_v59  ;;  %v531_v7 = vadd.f32 %v467_v56, %v268_v60  ;;  %v269_v8 = vadd.f32 %v1139_v6, %v198_v61  ;;  %v199_v9 = vmul.f32 %v846_v62, %v1126_v1  ;;  %v849_v10 = vunpack.c.l.bf16 %v1039_v58 }
  0x53   :  { %v664_v11 = vmax.f32 %v600_v0, 0.0  ;;  %v601_v12 = vadd.f32 %v1164_v25, %v530_v2  ;;  %v469_v13 = vmul.f32 %v974_v5, %v1134_v4  ;;  %v977_v14 = vunpack.c.l.bf16 %v1070_v63 }
  0x54   :  { %v602_v15 = vadd.f32 %v1164_v25, %v531_v7  ;;  %v532_v16 = vadd.f32 %v468_v3, %v269_v8  ;;  %v270_v17 = vadd.f32 %v1139_v6, %v199_v9  ;;  %v200_v18 = vmul.f32 %v849_v10, %v1126_v1 }
  0x55   :  { %728 = vst [vmem:[%s1806_s6 + $0x128] sm:$0xff] %v664_v11  ;;  %v665_v21 = vmax.f32 %v601_v12, 0.0  ;;  %v470_v22 = vmul.f32 %v977_v14, %v1134_v4  ;;  %v850_v23 = vunpack.c.h.bf16 %v1039_v58  ;;  %v978_v24 = vunpack.c.h.bf16 %v1070_v63  ;;  %v1074_v14 = vld [vmem:[%s1803_s3 + $0xc8] sm:$0xff]  }
  0x56   :  { %v666_v26 = vmax.f32 %v602_v15, 0.0  ;;  %v603_v27 = vadd.f32 %v1164_v25, %v532_v16  ;;  %v533_v28 = vadd.f32 %v469_v13, %v270_v17  ;;  %v271_v29 = vadd.f32 %v1139_v6, %v200_v18  ;;  %v1043_v13 = vld [vmem:[%s1800_s0 + $0xc8] sm:$0xff]  }
  0x57   :  { %729 = vst [vmem:[%s1806_s6 + $0x130] sm:$0xff] %v665_v21  ;;  %v201_v30 = vmul.f32 %v850_v23, %v1126_v1  ;;  %v471_v31 = vmul.f32 %v978_v24, %v1134_v4  ;;  %v853_v32 = vunpack.c.l.bf16 %v1040_v19  ;;  %v981_v33 = vunpack.c.l.bf16 %v1071_v20 }
  0x58   :  { %730 = vst [vmem:[%s1806_s6 + $0x138] sm:$0xff] %v666_v26  ;;  %v667_v35 = vmax.f32 %v603_v27, 0.0  ;;  %v604_v36 = vadd.f32 %v1164_v25, %v533_v28  ;;  %v534_v37 = vadd.f32 %v470_v22, %v271_v29  ;;  %v854_v38 = vunpack.c.h.bf16 %v1040_v19  ;;  %v1044_v28 = vld [vmem:[%s1800_s0 + $0xd0] sm:$0xff]  }
  0x59   :  { %v272_v40 = vadd.f32 %v1139_v6, %v201_v30  ;;  %v202_v41 = vmul.f32 %v853_v32, %v1126_v1  ;;  %v472_v42 = vmul.f32 %v981_v33, %v1134_v4  ;;  %v982_v43 = vunpack.c.h.bf16 %v1071_v20  ;;  %v1075_v33 = vld [vmem:[%s1803_s3 + $0xd0] sm:$0xff]  }
  0x5a   :  { %731 = vst [vmem:[%s1806_s6 + $0x140] sm:$0xff] %v667_v35  ;;  %v668_v44 = vmax.f32 %v604_v36, 0.0  ;;  %v605_v45 = vadd.f32 %v1164_v25, %v534_v37  ;;  %v203_v46 = vmul.f32 %v854_v38, %v1126_v1  ;;  %v857_v47 = vunpack.c.l.bf16 %v1041_v34 }
  0x5b   :  { %v535_v48 = vadd.f32 %v471_v31, %v272_v40  ;;  %v273_v49 = vadd.f32 %v1139_v6, %v202_v41  ;;  %v473_v50 = vmul.f32 %v982_v43, %v1134_v4  ;;  %v985_v51 = vunpack.c.l.bf16 %v1072_v39 }
  0x5c   :  { %732 = vst [vmem:[%s1806_s6 + $0x148] sm:$0xff] %v668_v44  ;;  %v669_v53 = vmax.f32 %v605_v45, 0.0  ;;  %v274_v54 = vadd.f32 %v1139_v6, %v203_v46  ;;  %v204_v55 = vmul.f32 %v857_v47, %v1126_v1  ;;  %v858_v56 = vunpack.c.h.bf16 %v1041_v34  ;;  %v1045_v46 = vld [vmem:[%s1800_s0 + $0xd8] sm:$0xff]  }
  0x5d   :  { %v606_v58 = vadd.f32 %v1164_v25, %v535_v48  ;;  %v536_v59 = vadd.f32 %v472_v42, %v273_v49  ;;  %v474_v60 = vmul.f32 %v985_v51, %v1134_v4  ;;  %v986_v61 = vunpack.c.h.bf16 %v1072_v39 }
  0x5e   :  { %733 = vst [vmem:[%s1806_s6 + $0x150] sm:$0xff] %v669_v53  ;;  %v537_v62 = vadd.f32 %v473_v50, %v274_v54  ;;  %v275_v63 = vadd.f32 %v1139_v6, %v204_v55  ;;  %v205_v0 = vmul.f32 %v858_v56, %v1126_v1  ;;  %v861_v2 = vunpack.c.l.bf16 %v1042_v52  ;;  %v1076_v50 = vld [vmem:[%s1803_s3 + $0xd8] sm:$0xff]   ;;  %v1672_v53 = vld [vmem:[%s1804_s4] ss:$0 sm:$0xff] }
  0x5f   :  { %v670_v3 = vmax.f32 %v606_v58, 0.0  ;;  %v607_v5 = vadd.f32 %v1164_v25, %v536_v59  ;;  %v475_v7 = vmul.f32 %v986_v61, %v1134_v4  ;;  %v989_v8 = vunpack.c.l.bf16 %v1073_v57 }
  0x60   :  { %v608_v9 = vadd.f32 %v1164_v25, %v537_v62  ;;  %v538_v10 = vadd.f32 %v474_v60, %v275_v63  ;;  %v276_v11 = vadd.f32 %v1139_v6, %v205_v0  ;;  %v206_v12 = vmul.f32 %v861_v2, %v1126_v1 }
  0x61   :  { %734 = vst [vmem:[%s1806_s6 + $0x158] sm:$0xff] %v670_v3  ;;  %v671_v15 = vmax.f32 %v607_v5, 0.0  ;;  %v476_v16 = vmul.f32 %v989_v8, %v1134_v4  ;;  %v862_v17 = vunpack.c.h.bf16 %v1042_v52  ;;  %v990_v18 = vunpack.c.h.bf16 %v1073_v57  ;;  %v1077_v8 = vld [vmem:[%s1803_s3 + $0xe0] sm:$0xff]  }
  0x62   :  { %v672_v19 = vmax.f32 %v608_v9, 0.0  ;;  %v609_v20 = vadd.f32 %v1164_v25, %v538_v10  ;;  %v539_v21 = vadd.f32 %v475_v7, %v276_v11  ;;  %v277_v22 = vadd.f32 %v1139_v6, %v206_v12  ;;  %v1046_v7 = vld [vmem:[%s1800_s0 + $0xe0] sm:$0xff]  }
  0x63   :  { %735 = vst [vmem:[%s1806_s6 + $0x160] sm:$0xff] %v671_v15  ;;  %v207_v23 = vmul.f32 %v862_v17, %v1126_v1  ;;  %v477_v24 = vmul.f32 %v990_v18, %v1134_v4  ;;  %v865_v26 = vunpack.c.l.bf16 %v1043_v13  ;;  %v993_v27 = vunpack.c.l.bf16 %v1074_v14 }
  0x64   :  { %736 = vst [vmem:[%s1806_s6 + $0x168] sm:$0xff] %v672_v19  ;;  %v673_v29 = vmax.f32 %v609_v20, 0.0  ;;  %v610_v30 = vadd.f32 %v1164_v25, %v539_v21  ;;  %v540_v31 = vadd.f32 %v476_v16, %v277_v22  ;;  %v866_v32 = vunpack.c.h.bf16 %v1043_v13  ;;  %v1698_v13 = vld [vmem:[%s1805_s5] ss:$0 sm:$0xff]  ;;  %v1047_v21 = vld [vmem:[%s1800_s0 + $0xe8] sm:$0xff]  }
  0x65   :  { %v278_v34 = vadd.f32 %v1139_v6, %v207_v23  ;;  %v208_v35 = vmul.f32 %v865_v26, %v1126_v1  ;;  %v478_v36 = vmul.f32 %v993_v27, %v1134_v4  ;;  %v994_v37 = vunpack.c.h.bf16 %v1074_v14  ;;  %v1078_v27 = vld [vmem:[%s1803_s3 + $0xe8] sm:$0xff]  }
  0x66   :  { %737 = vst [vmem:[%s1806_s6 + $0x170] sm:$0xff] %v673_v29  ;;  %v674_v38 = vmax.f32 %v610_v30, 0.0  ;;  %v611_v39 = vadd.f32 %v1164_v25, %v540_v31  ;;  %v209_v40 = vmul.f32 %v866_v32, %v1126_v1  ;;  %v869_v41 = vunpack.c.l.bf16 %v1044_v28  ;;  %v1656_v1 = vld [vmem:[%s1802_s2] ss:$0 sm:$0xff] }
  0x67   :  { %v541_v42 = vadd.f32 %v477_v24, %v278_v34  ;;  %v279_v43 = vadd.f32 %v1139_v6, %v208_v35  ;;  %v479_v44 = vmul.f32 %v994_v37, %v1134_v4  ;;  %v997_v45 = vunpack.c.l.bf16 %v1075_v33  ;;  %v1662_v4 = vld [vmem:[%s1801_s1] ss:$0 sm:$0xff] }
  0x68   :  { %738 = vst [vmem:[%s1806_s6 + $0x178] sm:$0xff] %v674_v38  ;;  %v675_v47 = vmax.f32 %v611_v39, 0.0  ;;  %v280_v48 = vadd.f32 %v1656_v1, %v209_v40  ;;  %v210_v6 = vmul.f32 %v1662_v4, %v869_v41  ;;  %v870_v49 = vunpack.c.h.bf16 %v1044_v28  ;;  %v1048_v40 = vld [vmem:[%s1800_s0 + $0xf0] sm:$0xff]  }
  0x69   :  { %v612_v51 = vadd.f32 %v1164_v25, %v541_v42  ;;  %v542_v52 = vadd.f32 %v478_v36, %v279_v43  ;;  %v480_v54 = vmul.f32 %v1672_v53, %v997_v45  ;;  %v998_v55 = vunpack.c.h.bf16 %v1075_v33  ;;  %v1079_v45 = vld [vmem:[%s1803_s3 + $0xf0] sm:$0xff]  }
  0x6a   :  { %739 = vst [vmem:[%s1806_s6 + $0x180] sm:$0xff] %v675_v47  ;;  %v543_v56 = vadd.f32 %v479_v44, %v280_v48  ;;  %v281_v57 = vadd.f32 %v1656_v1, %v210_v6  ;;  %v211_v58 = vmul.f32 %v1662_v4, %v870_v49  ;;  %v873_v59 = vunpack.c.l.bf16 %v1045_v46 }
  0x6b   :  { %v676_v60 = vmax.f32 %v612_v51, 0.0  ;;  %v613_v61 = vadd.f32 %v1164_v25, %v542_v52  ;;  %v481_v62 = vmul.f32 %v1672_v53, %v998_v55  ;;  %v1001_v63 = vunpack.c.l.bf16 %v1076_v50 }
  0x6c   :  { %v614_v0 = vadd.f32 %v1164_v25, %v543_v56  ;;  %v544_v2 = vadd.f32 %v480_v54, %v281_v57  ;;  %v282_v3 = vadd.f32 %v1656_v1, %v211_v58  ;;  %v212_v5 = vmul.f32 %v1662_v4, %v873_v59 }
  0x6d   :  { %740 = vst [vmem:[%s1806_s6 + $0x188] sm:$0xff] %v676_v60  ;;  %v677_v9 = vmax.f32 %v613_v61, 0.0  ;;  %v482_v25 = vmul.f32 %v1672_v53, %v1001_v63  ;;  %v874_v10 = vunpack.c.h.bf16 %v1045_v46  ;;  %v1002_v11 = vunpack.c.h.bf16 %v1076_v50  ;;  %v1080_v63 = vld [vmem:[%s1803_s3 + $0xf8] sm:$0xff]  }
  0x6e   :  { %v678_v12 = vmax.f32 %v614_v0, 0.0  ;;  %v615_v14 = vadd.f32 %v1698_v13, %v544_v2  ;;  %v545_v15 = vadd.f32 %v481_v62, %v282_v3  ;;  %v283_v16 = vadd.f32 %v1656_v1, %v212_v5  ;;  %v1049_v62 = vld [vmem:[%s1800_s0 + $0xf8] sm:$0xff]  }
  0x6f   :  { %741 = vst [vmem:[%s1806_s6 + $0x190] sm:$0xff] %v677_v9  ;;  %v213_v17 = vmul.f32 %v1662_v4, %v874_v10  ;;  %v483_v18 = vmul.f32 %v1672_v53, %v1002_v11  ;;  %v877_v19 = vunpack.c.l.bf16 %v1046_v7  ;;  %v1005_v20 = vunpack.c.l.bf16 %v1077_v8 }
  0x70   :  { %742 = vst [vmem:[%s1806_s6 + $0x198] sm:$0xff] %v678_v12  ;;  %v679_v22 = vmax.f32 %v615_v14, 0.0  ;;  %v616_v23 = vadd.f32 %v1698_v13, %v545_v15  ;;  %v546_v24 = vadd.f32 %v482_v25, %v283_v16  ;;  %v878_v26 = vunpack.c.h.bf16 %v1046_v7 }
  0x71   :  { %v284_v28 = vadd.f32 %v1656_v1, %v213_v17  ;;  %v214_v29 = vmul.f32 %v1662_v4, %v877_v19  ;;  %v484_v30 = vmul.f32 %v1672_v53, %v1005_v20  ;;  %v1006_v31 = vunpack.c.h.bf16 %v1077_v8 }
  0x72   :  { %743 = vst [vmem:[%s1806_s6 + $0x1a0] sm:$0xff] %v679_v22  ;;  %v680_v32 = vmax.f32 %v616_v23, 0.0  ;;  %v617_v33 = vadd.f32 %v1698_v13, %v546_v24  ;;  %v215_v34 = vmul.f32 %v1662_v4, %v878_v26  ;;  %v881_v35 = vunpack.c.l.bf16 %v1047_v21 }
  0x73   :  { %v547_v36 = vadd.f32 %v483_v18, %v284_v28  ;;  %v285_v37 = vadd.f32 %v1656_v1, %v214_v29  ;;  %v485_v38 = vmul.f32 %v1672_v53, %v1006_v31  ;;  %v1009_v39 = vunpack.c.l.bf16 %v1078_v27 }
  0x74   :  { %744 = vst [vmem:[%s1806_s6 + $0x1a8] sm:$0xff] %v680_v32  ;;  %v681_v41 = vmax.f32 %v617_v33, 0.0  ;;  %v286_v42 = vadd.f32 %v1656_v1, %v215_v34  ;;  %v216_v43 = vmul.f32 %v1662_v4, %v881_v35  ;;  %v882_v44 = vunpack.c.h.bf16 %v1047_v21 }
  0x75   :  { %v618_v46 = vadd.f32 %v1698_v13, %v547_v36  ;;  %v548_v47 = vadd.f32 %v484_v30, %v285_v37  ;;  %v486_v48 = vmul.f32 %v1672_v53, %v1009_v39  ;;  %v1010_v6 = vunpack.c.h.bf16 %v1078_v27 }
  0x76   :  { %745 = vst [vmem:[%s1806_s6 + $0x1b0] sm:$0xff] %v681_v41  ;;  %v549_v49 = vadd.f32 %v485_v38, %v286_v42  ;;  %v287_v50 = vadd.f32 %v1656_v1, %v216_v43  ;;  %v217_v51 = vmul.f32 %v1662_v4, %v882_v44  ;;  %v885_v52 = vunpack.c.l.bf16 %v1048_v40 }
  0x77   :  { %v682_v54 = vmax.f32 %v618_v46, 0.0  ;;  %v619_v55 = vadd.f32 %v1698_v13, %v548_v47  ;;  %v487_v56 = vmul.f32 %v1672_v53, %v1010_v6  ;;  %v1013_v57 = vunpack.c.l.bf16 %v1079_v45 }
  0x78   :  { %v620_v58 = vadd.f32 %v1698_v13, %v549_v49  ;;  %v550_v59 = vadd.f32 %v486_v48, %v287_v50  ;;  %v288_v60 = vadd.f32 %v1656_v1, %v217_v51  ;;  %v218_v61 = vmul.f32 %v1662_v4, %v885_v52 }
  0x79   :  { %746 = vst [vmem:[%s1806_s6 + $0x1b8] sm:$0xff] %v682_v54  ;;  %v683_v0 = vmax.f32 %v619_v55, 0.0  ;;  %v488_v2 = vmul.f32 %v1672_v53, %v1013_v57  ;;  %v886_v3 = vunpack.c.h.bf16 %v1048_v40  ;;  %v1014_v5 = vunpack.c.h.bf16 %v1079_v45 }
  0x7a   :  { %v684_v7 = vmax.f32 %v620_v58, 0.0  ;;  %v621_v8 = vadd.f32 %v1698_v13, %v550_v59  ;;  %v551_v9 = vadd.f32 %v487_v56, %v288_v60  ;;  %v289_v25 = vadd.f32 %v1656_v1, %v218_v61 }
  0x7b   :  { %747 = vst [vmem:[%s1806_s6 + $0x1c0] sm:$0xff] %v683_v0  ;;  %v219_v10 = vmul.f32 %v1662_v4, %v886_v3  ;;  %v489_v11 = vmul.f32 %v1672_v53, %v1014_v5  ;;  %v889_v12 = vunpack.c.l.bf16 %v1049_v62  ;;  %v1017_v14 = vunpack.c.l.bf16 %v1080_v63 }
  0x7c   :  { %748 = vst [vmem:[%s1806_s6 + $0x1c8] sm:$0xff] %v684_v7  ;;  %v685_v15 = vmax.f32 %v621_v8, 0.0  ;;  %v622_v16 = vadd.f32 %v1698_v13, %v551_v9  ;;  %v552_v17 = vadd.f32 %v488_v2, %v289_v25  ;;  %v890_v18 = vunpack.c.h.bf16 %v1049_v62 }
  0x7d   :  { %v290_v19 = vadd.f32 %v1656_v1, %v219_v10  ;;  %v220_v20 = vmul.f32 %v1662_v4, %v889_v12  ;;  %v490_v21 = vmul.f32 %v1672_v53, %v1017_v14  ;;  %v1018_v22 = vunpack.c.h.bf16 %v1080_v63 }
  0x7e   :  { %749 = vst [vmem:[%s1806_s6 + $0x1d0] sm:$0xff] %v685_v15  ;;  %v686_v23 = vmax.f32 %v622_v16, 0.0  ;;  %v623_v24 = vadd.f32 %v1698_v13, %v552_v17  ;;  %v221_v26 = vmul.f32 %v1662_v4, %v890_v18 }
  0x7f   :  { %v553_v27 = vadd.f32 %v489_v11, %v290_v19  ;;  %v291_v28 = vadd.f32 %v1656_v1, %v220_v20  ;;  %v491_v29 = vmul.f32 %v1672_v53, %v1018_v22 }
  0x80   :  { %750 = vst [vmem:[%s1806_s6 + $0x1d8] sm:$0xff] %v686_v23  ;;  %v687_v30 = vmax.f32 %v623_v24, 0.0  ;;  %v292_v31 = vadd.f32 %v1656_v1, %v221_v26 }
  0x81   :  { %v624_v32 = vadd.f32 %v1698_v13, %v553_v27  ;;  %v554_v33 = vadd.f32 %v490_v21, %v291_v28 }
  0x82   :  { %751 = vst [vmem:[%s1806_s6 + $0x1e0] sm:$0xff] %v687_v30  ;;  %v555_v4 = vadd.f32 %v491_v29, %v292_v31 }
  0x83   :  { %v688_v34 = vmax.f32 %v624_v32, 0.0  ;;  %v625_v35 = vadd.f32 %v1698_v13, %v554_v33 }
  0x84   :  { %v626_v53 = vadd.f32 %v1698_v13, %v555_v4 }
  0x85   :  { %752 = vst [vmem:[%s1806_s6 + $0x1e8] sm:$0xff] %v688_v34  ;;  %v689_v36 = vmax.f32 %v625_v35, 0.0 }
  0x86   :  { %v690_v37 = vmax.f32 %v626_v53, 0.0 }
  0x87   :  { %753 = vst [vmem:[%s1806_s6 + $0x1f0] sm:$0xff] %v689_v36 }
  0x88   :  { %754 = vst [vmem:[%s1806_s6 + $0x1f8] sm:$0xff] %v690_v37 }

// kernel: basic_block_forward.3
= control target key start
LH: loop header
LB: loop body
LE: loop exit
PB: predicated region body
PF: predicated region fallthrough
CT: control target
= control target key end

     0   :  { %s1724_s12 = smov 0   ;;  %s1726_s13 = smov 0   ;;  %s1965_s0 = inlined_call_operand.vmem [shape: bf16[512,256], index: 0, kind: input, shape index: {}]   ;;  %s1966_s1 = inlined_call_operand.vmem [shape: bf16[256,128], index: 1, kind: input, shape index: {}]   ;;  %s1967_s2 = inlined_call_operand.vmem [shape: bf16[512,128], index: 2, kind: output, shape index: {0}]   ;;  %s1968_s3 = inlined_call_operand.vmem [shape: f32[2,2,128], index: 3, kind: output, shape index: {1}]  }
   0x1   :  { %s1728_s14 = smov 0  }
   0x2 LB: > { %s26_s15 = sadd.s32 1, %s1698_s13  ;;  %p1247_p0 = scmp.ge.s32.totalorder %s1702_s14, 1  ;;  %s1702_s14 = sphi %s1728_s14, %s14_s14   ;;  %s1698_s13 = sphi %s1726_s13, %s1970_s13   ;;  %s1694_s12 = sphi %s1724_s12, %s1969_s12  }
   0x3   : > { %p28_p1 = scmp.ge.s32.totalorder %s26_s15, 2  ;;  %p161_p2 = scmp.lt.s32.totalorder %s1702_s14, 3 }
   0x5   : > { %s1972_s15 = smov (%p28_p1, %s26_s15), 0  ;;  %p162_p3 = pnand %p1247_p0, %p161_p2 }
   0x6   : > { %s1248_s18 = sshll.u32 (!%p162_p3), %s1694_s12, 5  ;;  %p212_p5 = scmp.lt.s32.totalorder (!%p162_p3), %s1694_s12, 1 }
   0x7   : > { %165 = sbr.rel (%p162_p3) target bundleno = 352 (0x160), region = 28  ;;  %p196_p4 = scmp.lt.s32.totalorder (!%p162_p3), %s1248_s18, 63 }
   0xc   : > { %v1616_v0 = vld [vmem:[%s1966_s1 + $0x78] sm:$0xff]   ;;  %v1618_v2 = vld [vmem:[%s1966_s1 + $0x70] sm:$0xff]   ;;  %v1620_v4 = vld [vmem:[%s1966_s1 + $0x68] sm:$0xff]   ;;  %s1974_s18 = smov (!%p196_p4, %s1248_s18), 63  ;;  %s1976_s12 = smov (!%p212_p5, %s1694_s12), 1  ;;  %vm1136_vm0 = vcmask 1040384  }
   0xd   : > { %v1617_v1 = vld [vmem:[%s1966_s1 + $0x38] sm:$0xff]   ;;  %1464 = vmatprep.subr.bf16.mxu0 %v1616_v0  ;;  %1576 = vmatprep.subr.bf16.mxu1 %v1616_v0  ;;  %v1619_v3 = vld [vmem:[%s1966_s1 + $0x30] sm:$0xff]   ;;  %v1621_v5 = vld [vmem:[%s1966_s1 + $0x28] sm:$0xff]   ;;  %s1336_s6 = sshll.u32 %s1974_s18, 3  ;;  %s1252_s4 = sshll.u32 %s1974_s18, 2 }
   0xe   : > { %1465 = vmatpush3.bf16.msra.mxu0 %v1617_v1  ;;  %1584 = vmatpush3.bf16.msra.mxu1 %v1617_v1  ;;  %v1622_v6 = vld [vmem:[%s1966_s1 + $0x60] sm:$0xff]   ;;  %v1624_v8 = vld [vmem:[%s1966_s1 + $0x58] sm:$0xff]   ;;  %s1778_s11 = scalar_lea.vmem %s1965_s0, %s1336_s6  ;;  %v1626_v10 = vld [vmem:[%s1966_s1 + $0x50] sm:$0xff]   ;;  %s1843_s7 = scalar_lea.vmem %s1967_s2, %s1252_s4 }
   0xf   : > { %1466 = vmatprep.subr.bf16.mxu0 %v1618_v2  ;;  %1577 = vmatprep.subr.bf16.mxu1 %v1618_v2  ;;  %v1623_v7 = vld [vmem:[%s1966_s1 + $0x20] sm:$0xff]   ;;  %v1625_v9 = vld [vmem:[%s1966_s1 + $0x18] sm:$0xff]   ;;  %v1627_v12 = vld [vmem:[%s1966_s1 + $0x10] sm:$0xff]   ;;  %s1253_s18 = sshll.u32 %s1976_s12, 1 }
  0x10   : > { %v1634_v11 = vld [vmem:[%s1778_s11 + $0x4] ss:$8 sps:$4 sm:$0xff]   ;;  %v1632_v18 = vld [vmem:[%s1778_s11] ss:$8 sps:$4 sm:$0xff]   ;;  %v1635_v19 = vld [vmem:[%s1778_s11 + $0x14] ss:$8 sps:$4 sm:$0xff]   ;;  %s215_s10 = scalar_lea.vmem %s1968_s3, %s1253_s18 }
  0x11   : > { %642 = vmatprep.mubr.bf16.mxu0 %v1634_v11  ;;  %v1628_v13 = vld [vmem:[%s1966_s1 + $0x48] sm:$0xff]   ;;  %v1630_v16 = vld [vmem:[%s1966_s1 + $0x40] sm:$0xff]   ;;  %v1650_v21 = vld [vmem:[%s1778_s11 + $0x94] ss:$8 sps:$4 sm:$0xff]  }
  0x12   : > { %1467 = vmatpush3.bf16.msra.mxu0 %v1619_v3  ;;  %1585 = vmatpush3.bf16.msra.mxu1 %v1619_v3  ;;  %v1646_v14 = vld [vmem:[%s1778_s11 + $0x84] ss:$8 sps:$4 sm:$0xff]   ;;  %v1644_v20 = vld [vmem:[%s1778_s11 + $0x80] ss:$8 sps:$4 sm:$0xff]   ;;  %v1637_v22 = vld [vmem:[%s1778_s11 + $0x10] ss:$8 sps:$4 sm:$0xff]  }
  0x13   : > { %1468 = vmatprep.subr.bf16.mxu0 %v1620_v4  ;;  %1578 = vmatprep.subr.bf16.mxu1 %v1620_v4  ;;  %v1629_v15 = vld [vmem:[%s1966_s1 + $0x8] sm:$0xff]   ;;  %v1631_v17 = vld [vmem:[%s1966_s1] sm:$0xff]   ;;  %v1652_v24 = vld [vmem:[%s1778_s11 + $0x90] ss:$8 sps:$4 sm:$0xff]  }
  0x14   : > { %706 = vmatprep.mubr.bf16.mxu1 %v1646_v14  ;;  %v1638_v23 = vld [vmem:[%s1778_s11 + $0x24] ss:$8 sps:$4 sm:$0xff]   ;;  %v1640_v26 = vld [vmem:[%s1778_s11 + $0x20] ss:$8 sps:$4 sm:$0xff]   ;;  %v1641_v27 = vld [vmem:[%s1778_s11 + $0x34] ss:$8 sps:$4 sm:$0xff]  }
  0x15   : > { %v1656_v25 = vld [vmem:[%s1778_s11 + $0xa4] ss:$8 sps:$4 sm:$0xff]   ;;  %v1658_v28 = vld [vmem:[%s1778_s11 + $0xa0] ss:$8 sps:$4 sm:$0xff]   ;;  %v1662_v29 = vld [vmem:[%s1778_s11 + $0xb4] ss:$8 sps:$4 sm:$0xff]  }
  0x16   : > { %1469 = vmatpush3.bf16.msra.mxu0 %v1621_v5  ;;  %1586 = vmatpush3.bf16.msra.mxu1 %v1621_v5  ;;  %v1643_v30 = vld [vmem:[%s1778_s11 + $0x30] ss:$8 sps:$4 sm:$0xff]   ;;  %v1647_v31 = vld [vmem:[%s1778_s11 + $0x44] ss:$8 sps:$4 sm:$0xff]   ;;  %v1649_v34 = vld [vmem:[%s1778_s11 + $0x40] ss:$8 sps:$4 sm:$0xff]  }
  0x17   : > { %1470 = vmatprep.subr.bf16.mxu0 %v1622_v6  ;;  %1579 = vmatprep.subr.bf16.mxu1 %v1622_v6  ;;  %v1664_v32 = vld [vmem:[%s1778_s11 + $0xb0] ss:$8 sps:$4 sm:$0xff]   ;;  %v1668_v33 = vld [vmem:[%s1778_s11 + $0xc4] ss:$8 sps:$4 sm:$0xff]   ;;  %v1653_v35 = vld [vmem:[%s1778_s11 + $0x54] ss:$8 sps:$4 sm:$0xff]  }
  0x18   : > { %v1670_v36 = vld [vmem:[%s1778_s11 + $0xc0] ss:$8 sps:$4 sm:$0xff]   ;;  %v1671_v37 = vld [vmem:[%s1778_s11 + $0xd4] ss:$8 sps:$4 sm:$0xff]   ;;  %v1655_v38 = vld [vmem:[%s1778_s11 + $0x50] ss:$8 sps:$4 sm:$0xff]  }
  0x19   : > { %v1659_v39 = vld [vmem:[%s1778_s11 + $0x64] ss:$8 sps:$4 sm:$0xff]   ;;  %v1673_v40 = vld [vmem:[%s1778_s11 + $0xd0] ss:$8 sps:$4 sm:$0xff]   ;;  %v1661_v42 = vld [vmem:[%s1778_s11 + $0x60] ss:$8 sps:$4 sm:$0xff]  }
  0x1a   : > { %1471 = vmatpush3.bf16.msra.mxu0 %v1623_v7  ;;  %1587 = vmatpush3.bf16.msra.mxu1 %v1623_v7  ;;  %v1674_v41 = vld [vmem:[%s1778_s11 + $0xe4] ss:$8 sps:$4 sm:$0xff]   ;;  %v1665_v43 = vld [vmem:[%s1778_s11 + $0x74] ss:$8 sps:$4 sm:$0xff]   ;;  %v1676_v44 = vld [vmem:[%s1778_s11 + $0xe0] ss:$8 sps:$4 sm:$0xff]  }
  0x1b   : > { %1472 = vmatprep.subr.bf16.mxu0 %v1624_v8  ;;  %1580 = vmatprep.subr.bf16.mxu1 %v1624_v8  ;;  %v1677_v45 = vld [vmem:[%s1778_s11 + $0xf4] ss:$8 sps:$4 sm:$0xff]   ;;  %v1667_v46 = vld [vmem:[%s1778_s11 + $0x70] ss:$8 sps:$4 sm:$0xff]  }
  0x1c   : > { %v1679_v47 = vld [vmem:[%s1778_s11 + $0xf0] ss:$8 sps:$4 sm:$0xff]  }
  0x1e   : > { %1473 = vmatpush3.bf16.msra.mxu0 %v1625_v9  ;;  %1588 = vmatpush3.bf16.msra.mxu1 %v1625_v9 }
  0x1f   : > { %1474 = vmatprep.subr.bf16.mxu0 %v1626_v10  ;;  %1581 = vmatprep.subr.bf16.mxu1 %v1626_v10 }
  0x22   : > { %1475 = vmatpush3.bf16.msra.mxu0 %v1627_v12  ;;  %1589 = vmatpush3.bf16.msra.mxu1 %v1627_v12 }
  0x23   : > { %1476 = vmatprep.subr.bf16.mxu0 %v1628_v13  ;;  %1582 = vmatprep.subr.bf16.mxu1 %v1628_v13 }
  0x26   : > { %1477 = vmatpush3.bf16.msra.mxu0 %v1629_v15  ;;  %1590 = vmatpush3.bf16.msra.mxu1 %v1629_v15 }
  0x27   : > { %1478 = vmatprep.subr.bf16.mxu0 %v1630_v16  ;;  %1583 = vmatprep.subr.bf16.mxu1 %v1630_v16 }
  0x2a   : > { %1479 = vmatpush3.bf16.msra.mxu0 %v1631_v17  ;;  %1591 = vmatpush3.bf16.msra.mxu1 %v1631_v17 }
  0x2d   : > { %643 = vmatmul.mubr.bf16.vlgmr.msra.gmra.mxu0 %v1632_v18  ;;  %707 = vmatmul.mubr.bf16.vlgmr.msra.gmra.mxu1 %v1644_v20 }
  0x2e   : > { %650 = vmatprep.mubr.bf16.mxu0 %v1635_v19  ;;  %714 = vmatprep.mubr.bf16.mxu1 %v1650_v21 }
  0x35   : > { %651 = vmatmul.mubr.bf16.gmra.mxu0 %v1637_v22  ;;  %715 = vmatmul.mubr.bf16.gmra.mxu1 %v1652_v24 }
  0x36   : > { %658 = vmatprep.mubr.bf16.mxu0 %v1638_v23  ;;  %722 = vmatprep.mubr.bf16.mxu1 %v1656_v25 }
  0x3d   : > { %659 = vmatmul.mubr.bf16.gmra.mxu0 %v1640_v26  ;;  %723 = vmatmul.mubr.bf16.gmra.mxu1 %v1658_v28 }
  0x3e   : > { %666 = vmatprep.mubr.bf16.mxu0 %v1641_v27  ;;  %730 = vmatprep.mubr.bf16.mxu1 %v1662_v29 }
  0x45   : > { %667 = vmatmul.mubr.bf16.gmra.mxu0 %v1643_v30  ;;  %731 = vmatmul.mubr.bf16.gmra.mxu1 %v1664_v32 }
  0x46   : > { %674 = vmatprep.mubr.bf16.mxu0 %v1647_v31  ;;  %738 = vmatprep.mubr.bf16.mxu1 %v1668_v33 }
  0x4d   : > { %675 = vmatmul.mubr.bf16.gmra.mxu0 %v1649_v34  ;;  %739 = vmatmul.mubr.bf16.gmra.mxu1 %v1670_v36 }
  0x4e   : > { %682 = vmatprep.mubr.bf16.mxu0 %v1653_v35  ;;  %746 = vmatprep.mubr.bf16.mxu1 %v1671_v37 }
  0x55   : > { %683 = vmatmul.mubr.bf16.gmra.mxu0 %v1655_v38  ;;  %747 = vmatmul.mubr.bf16.gmra.mxu1 %v1673_v40 }
  0x56   : > { %690 = vmatprep.mubr.bf16.mxu0 %v1659_v39  ;;  %754 = vmatprep.mubr.bf16.mxu1 %v1674_v41 }
  0x5d   : > { %691 = vmatmul.mubr.bf16.gmra.mxu0 %v1661_v42  ;;  %755 = vmatmul.mubr.bf16.gmra.mxu1 %v1676_v44 }
  0x5e   : > { %698 = vmatprep.mubr.bf16.mxu0 %v1665_v43  ;;  %762 = vmatprep.mubr.bf16.mxu1 %v1677_v45 }
  0x65   : > { %699 = vmatmul.mubr.bf16.gmra.mxu0 %v1667_v46  ;;  %763 = vmatmul.mubr.bf16.gmra.mxu1 %v1679_v47 }
  0xed   : > { %v1480_v48 = vpop.f32.mrf.mxu0  ;;  %v1528_v49 = vpop.f32.mrf.mxu1 }
  0xef   : > { %v1481_v50 = vpop.f32.mrf.mxu0  ;;  %v1529_v51 = vpop.f32.mrf.mxu1 }
  0xf0   : > { %v1834_v55 = vadd.f32 %v1529_v51, %v1528_v49  ;;  %v1836_v56 = vadd.f32 %v1481_v50, %v1480_v48 }
  0xf1   : > { %v1483_v52 = vpop.f32.mrf.mxu0  ;;  %v1531_v53 = vpop.f32.mrf.mxu1 }
  0xf2   : > { %v1067_v45 = vmul.f32 %v1836_v56, %v1836_v56 }
  0xf3   : > { %v1484_v54 = vpop.f32.mrf.mxu0  ;;  %v1532_v58 = vpop.f32.mrf.mxu1 }
  0xf4   : > { %v1838_v57 = vadd.f32 %v1484_v54, %v1483_v52  ;;  %v1845_v60 = vadd.f32 %v1532_v58, %v1531_v53 }
  0xf5   : > { %v1486_v59 = vpop.f32.mrf.mxu0  ;;  %v1534_v62 = vpop.f32.mrf.mxu1 }
  0xf6   : > { %v1372_v61 = vpack.c.bf16 %v1838_v57, %v1836_v56  ;;  %v1412_v0 = vpack.c.bf16 %v1845_v60, %v1834_v55  ;;  %v1068_v41 = vmul.f32 %v1838_v57, %v1838_v57  ;;  %v1030_v48 = vadd.f32 %v1838_v57, %v1836_v56 }
  0xf7   : > { %v1487_v63 = vpop.f32.mrf.mxu0  ;;  %v1535_v1 = vpop.f32.mrf.mxu1 }
  0xf8   : > { %1373 = vst [vmem:[%s1843_s7] sm:$0xff] %v1372_v61   ;;  %1456 = vst [vmem:[%s1843_s7 + $0x40] sm:$0xff] %v1412_v0   ;;  %v1853_v5 = vadd.f32 %v1535_v1, %v1534_v62  ;;  %v1488_v6 = vadd.f32 %v1487_v63, %v1486_v59  ;;  %v1099_v50 = vadd.f32 %v1068_v41, %v1067_v45 }
  0xf9   : > { %v1489_v2 = vpop.f32.mrf.mxu0  ;;  %v1537_v3 = vpop.f32.mrf.mxu1 }
  0xfa   : > { %v1069_v46 = vmul.f32 %v1488_v6, %v1488_v6  ;;  %v1031_v54 = vadd.f32 %v1488_v6, %v1030_v48 }
  0xfb   : > { %v1490_v4 = vpop.f32.mrf.mxu0  ;;  %v1538_v8 = vpop.f32.mrf.mxu1 }
  0xfc   : > { %v1491_v7 = vadd.f32 %v1490_v4, %v1489_v2  ;;  %v1855_v10 = vadd.f32 %v1538_v8, %v1537_v3  ;;  %v1100_v62 = vadd.f32 %v1099_v50, %v1069_v46 }
  0xfd   : > { %v1492_v9 = vpop.f32.mrf.mxu0  ;;  %v1540_v12 = vpop.f32.mrf.mxu1 }
  0xfe   : > { %v1377_v11 = vpack.c.bf16 %v1491_v7, %v1488_v6  ;;  %v1417_v14 = vpack.c.bf16 %v1855_v10, %v1853_v5  ;;  %v1070_v51 = vmul.f32 %v1491_v7, %v1491_v7  ;;  %v1032_v2 = vadd.f32 %v1491_v7, %v1031_v54 }
  0xff   : > { %v1493_v13 = vpop.f32.mrf.mxu0  ;;  %v1541_v15 = vpop.f32.mrf.mxu1 }
 0x100   : > { %1449 = vst [vmem:[%s1843_s7 + $0x8] sm:$0xff] %v1377_v11   ;;  %1457 = vst [vmem:[%s1843_s7 + $0x48] sm:$0xff] %v1417_v14   ;;  %v1861_v19 = vadd.f32 %v1541_v15, %v1540_v12  ;;  %v1494_v20 = vadd.f32 %v1493_v13, %v1492_v9  ;;  %v1101_v57 = vadd.f32 %v1100_v62, %v1070_v51 }
 0x101   : > { %v1495_v16 = vpop.f32.mrf.mxu0  ;;  %v1543_v17 = vpop.f32.mrf.mxu1 }
 0x102   : > { %v1071_v63 = vmul.f32 %v1494_v20, %v1494_v20  ;;  %v1033_v6 = vadd.f32 %v1494_v20, %v1032_v2 }
 0x103   : > { %v1496_v18 = vpop.f32.mrf.mxu0  ;;  %v1544_v22 = vpop.f32.mrf.mxu1 }
 0x104   : > { %v1497_v21 = vadd.f32 %v1496_v18, %v1495_v16  ;;  %v1863_v24 = vadd.f32 %v1544_v22, %v1543_v17  ;;  %v1102_v12 = vadd.f32 %v1101_v57, %v1071_v63 }
 0x105   : > { %v1498_v23 = vpop.f32.mrf.mxu0  ;;  %v1546_v26 = vpop.f32.mrf.mxu1 }
 0x106   : > { %v1382_v25 = vpack.c.bf16 %v1497_v21, %v1494_v20  ;;  %v1422_v28 = vpack.c.bf16 %v1863_v24, %v1861_v19  ;;  %v1072_v4 = vmul.f32 %v1497_v21, %v1497_v21  ;;  %v1034_v14 = vadd.f32 %v1497_v21, %v1033_v6 }
 0x107   : > { %v1499_v27 = vpop.f32.mrf.mxu0  ;;  %v1547_v29 = vpop.f32.mrf.mxu1 }
 0x108   : > { %1450 = vst [vmem:[%s1843_s7 + $0x10] sm:$0xff] %v1382_v25   ;;  %1458 = vst [vmem:[%s1843_s7 + $0x50] sm:$0xff] %v1422_v28   ;;  %v1869_v33 = vadd.f32 %v1547_v29, %v1546_v26  ;;  %v1500_v34 = vadd.f32 %v1499_v27, %v1498_v23  ;;  %v1103_v17 = vadd.f32 %v1102_v12, %v1072_v4 }
 0x109   : > { %v1501_v30 = vpop.f32.mrf.mxu0  ;;  %v1549_v31 = vpop.f32.mrf.mxu1 }
 0x10a   : > { %v1073_v15 = vmul.f32 %v1500_v34, %v1500_v34  ;;  %v1035_v22 = vadd.f32 %v1500_v34, %v1034_v14 }
 0x10b   : > { %v1502_v32 = vpop.f32.mrf.mxu0  ;;  %v1550_v36 = vpop.f32.mrf.mxu1 }
 0x10c   : > { %v1503_v35 = vadd.f32 %v1502_v32, %v1501_v30  ;;  %v1871_v38 = vadd.f32 %v1550_v36, %v1549_v31  ;;  %v1104_v29 = vadd.f32 %v1103_v17, %v1073_v15 }
 0x10d   : > { %v1504_v37 = vpop.f32.mrf.mxu0  ;;  %v1552_v40 = vpop.f32.mrf.mxu1 }
 0x10e   : > { %v1387_v39 = vpack.c.bf16 %v1503_v35, %v1500_v34  ;;  %v1427_v43 = vpack.c.bf16 %v1871_v38, %v1869_v33  ;;  %v1074_v23 = vmul.f32 %v1503_v35, %v1503_v35  ;;  %v1036_v30 = vadd.f32 %v1503_v35, %v1035_v22 }
 0x10f   : > { %v1505_v42 = vpop.f32.mrf.mxu0  ;;  %v1553_v44 = vpop.f32.mrf.mxu1 }
 0x110   : > { %1451 = vst [vmem:[%s1843_s7 + $0x18] sm:$0xff] %v1387_v39   ;;  %1459 = vst [vmem:[%s1843_s7 + $0x58] sm:$0xff] %v1427_v43   ;;  %v1883_v53 = vadd.f32 %v1553_v44, %v1552_v40  ;;  %v1506_v58 = vadd.f32 %v1505_v42, %v1504_v37  ;;  %v1105_v39 = vadd.f32 %v1104_v29, %v1074_v23 }
 0x111   : > { %v1507_v47 = vpop.f32.mrf.mxu0  ;;  %v1555_v49 = vpop.f32.mrf.mxu1 }
 0x112   : > { %v1075_v31 = vmul.f32 %v1506_v58, %v1506_v58  ;;  %v1037_v34 = vadd.f32 %v1506_v58, %v1036_v30 }
 0x113   : > { %v1508_v52 = vpop.f32.mrf.mxu0  ;;  %v1556_v61 = vpop.f32.mrf.mxu1 }
 0x114   : > { %v1509_v59 = vadd.f32 %v1508_v52, %v1507_v47  ;;  %v1885_v1 = vadd.f32 %v1556_v61, %v1555_v49  ;;  %v1106_v43 = vadd.f32 %v1105_v39, %v1075_v31 }
 0x115   : > { %v1510_v0 = vpop.f32.mrf.mxu0  ;;  %v1558_v56 = vpop.f32.mrf.mxu1 }
 0x116   : > { %v1392_v3 = vpack.c.bf16 %v1509_v59, %v1506_v58  ;;  %v1432_v9 = vpack.c.bf16 %v1885_v1, %v1883_v53  ;;  %v1076_v40 = vmul.f32 %v1509_v59, %v1509_v59  ;;  %v1038_v44 = vadd.f32 %v1509_v59, %v1037_v34 }
 0x117   : > { %v1511_v8 = vpop.f32.mrf.mxu0  ;;  %v1559_v11 = vpop.f32.mrf.mxu1 }
 0x118   : > { %1452 = vst [vmem:[%s1843_s7 + $0x20] sm:$0xff] %v1392_v3   ;;  %1460 = vst [vmem:[%s1843_s7 + $0x60] sm:$0xff] %v1432_v9   ;;  %v1891_v7 = vadd.f32 %v1559_v11, %v1558_v56  ;;  %v1512_v25 = vadd.f32 %v1511_v8, %v1510_v0  ;;  %v1107_v49 = vadd.f32 %v1106_v43, %v1076_v40 }
 0x119   : > { %v1513_v13 = vpop.f32.mrf.mxu0  ;;  %v1561_v16 = vpop.f32.mrf.mxu1  ;;  %v1085_v40 = vmul.f32 %v1853_v5, %v1853_v5  ;;  %v1086_v43 = vmul.f32 %v1855_v10, %v1855_v10 }
 0x11a   : > { %v1077_v45 = vmul.f32 %v1512_v25, %v1512_v25  ;;  %v1039_v50 = vadd.f32 %v1512_v25, %v1038_v44 }
 0x11b   : > { %v1514_v18 = vpop.f32.mrf.mxu0  ;;  %v1562_v27 = vpop.f32.mrf.mxu1 }
 0x11c   : > { %v1515_v26 = vadd.f32 %v1514_v18, %v1513_v13  ;;  %v1893_v28 = vadd.f32 %v1562_v27, %v1561_v16  ;;  %v1108_v62 = vadd.f32 %v1107_v49, %v1077_v45  ;;  %v1087_v45 = vmul.f32 %v1861_v19, %v1861_v19 }
 0x11d   : > { %v1516_v20 = vpop.f32.mrf.mxu0  ;;  %v1564_v32 = vpop.f32.mrf.mxu1 }
 0x11e   : > { %v1397_v21 = vpack.c.bf16 %v1515_v26, %v1512_v25  ;;  %v1437_v37 = vpack.c.bf16 %v1893_v28, %v1891_v7  ;;  %v1078_v51 = vmul.f32 %v1515_v26, %v1515_v26  ;;  %v1040_v63 = vadd.f32 %v1515_v26, %v1039_v50 }
 0x11f   : > { %v1517_v36 = vpop.f32.mrf.mxu0  ;;  %v1565_v41 = vpop.f32.mrf.mxu1 }
 0x120   : > { %1453 = vst [vmem:[%s1843_s7 + $0x28] sm:$0xff] %v1397_v21   ;;  %1461 = vst [vmem:[%s1843_s7 + $0x68] sm:$0xff] %v1437_v37   ;;  %v1518_v46 = vadd.f32 %v1517_v36, %v1516_v20  ;;  %v1899_v48 = vadd.f32 %v1565_v41, %v1564_v32  ;;  %v1109_v57 = vadd.f32 %v1108_v62, %v1078_v51 }
 0x121   : > { %v1519_v42 = vpop.f32.mrf.mxu0  ;;  %v1567_v47 = vpop.f32.mrf.mxu1  ;;  %v1083_v21 = vmul.f32 %v1834_v55, %v1834_v55  ;;  %v1084_v37 = vmul.f32 %v1845_v60, %v1845_v60 }
 0x122   : > { %v1079_v0 = vmul.f32 %v1518_v46, %v1518_v46  ;;  %v1041_v4 = vadd.f32 %v1518_v46, %v1040_v63  ;;  %v1092_v63 = vmul.f32 %v1885_v1, %v1885_v1 }
 0x123   : > { %v1520_v35 = vpop.f32.mrf.mxu0  ;;  %v1568_v54 = vpop.f32.mrf.mxu1 }
 0x124   : > { %v1521_v52 = vadd.f32 %v1520_v35, %v1519_v42  ;;  %v1901_v61 = vadd.f32 %v1568_v54, %v1567_v47  ;;  %v1110_v12 = vadd.f32 %v1109_v57, %v1079_v0 }
 0x125   : > { %v1522_v58 = vpop.f32.mrf.mxu0  ;;  %v1570_v2 = vpop.f32.mrf.mxu1 }
 0x126   : > { %v1402_v59 = vpack.c.bf16 %v1521_v52, %v1518_v46  ;;  %v1442_v56 = vpack.c.bf16 %v1901_v61, %v1899_v48  ;;  %v1080_v8 = vmul.f32 %v1521_v52, %v1521_v52  ;;  %v1042_v13 = vadd.f32 %v1521_v52, %v1041_v4 }
 0x127   : > { %v1523_v3 = vpop.f32.mrf.mxu0  ;;  %v1571_v6 = vpop.f32.mrf.mxu1 }
 0x128   : > { %1454 = vst [vmem:[%s1843_s7 + $0x30] sm:$0xff] %v1402_v59   ;;  %v1524_v9 = vadd.f32 %v1523_v3, %v1522_v58  ;;  %1462 = vst [vmem:[%s1843_s7 + $0x70] sm:$0xff] %v1442_v56   ;;  %v1572_v17 = vadd.f32 %v1571_v6, %v1570_v2  ;;  %v1111_v18 = vadd.f32 %v1110_v12, %v1080_v8 }
 0x129   : > { %v1525_v11 = vpop.f32.mrf.mxu0  ;;  %v1573_v15 = vpop.f32.mrf.mxu1  ;;  %v1093_v2 = vmul.f32 %v1891_v7, %v1891_v7 }
 0x12a   : > { %v1081_v14 = vmul.f32 %v1524_v9, %v1524_v9  ;;  %v1043_v22 = vadd.f32 %v1524_v9, %v1042_v13 }
 0x12b   : > { %v1526_v16 = vpop.f32.mrf.mxu0  ;;  %v1574_v25 = vpop.f32.mrf.mxu1 }
 0x12c   : > { %v1527_v23 = vadd.f32 %v1526_v16, %v1525_v11  ;;  %v1575_v26 = vadd.f32 %v1574_v25, %v1573_v15  ;;  %v1112_v27 = vadd.f32 %v1111_v18, %v1081_v14  ;;  %v1097_v11 = vmul.f32 %v1572_v17, %v1572_v17 }
 0x12e   : > { %v1407_v20 = vpack.c.bf16 %v1527_v23, %v1524_v9  ;;  %v1044_v29 = vadd.f32 %v1527_v23, %v1043_v22  ;;  %v1082_v30 = vmul.f32 %v1527_v23, %v1527_v23  ;;  %v1447_v31 = vpack.c.bf16 %v1575_v26, %v1572_v17 }
 0x12f   : > { %v1098_v14 = vmul.f32 %v1575_v26, %v1575_v26 }
 0x130   : > { %1455 = vst [vmem:[%s1843_s7 + $0x38] sm:$0xff] %v1407_v20   ;;  %v1045_v32 = vadd.f32 %v1834_v55, %v1044_v29  ;;  %v1113_v36 = vadd.f32 %v1112_v27, %v1082_v30  ;;  %1463 = vst [vmem:[%s1843_s7 + $0x78] sm:$0xff] %v1447_v31  }
 0x132   : > { %v1046_v39 = vadd.f32 %v1845_v60, %v1045_v32  ;;  %v1114_v34 = vadd.f32 %v1113_v36, %v1083_v21  ;;  %v1088_v60 = vmul.f32 %v1863_v24, %v1863_v24 }
 0x134   : > { %v1047_v41 = vadd.f32 %v1853_v5, %v1046_v39  ;;  %v1115_v42 = vadd.f32 %v1114_v34, %v1084_v37  ;;  %v1089_v5 = vmul.f32 %v1869_v33, %v1869_v33 }
 0x136   : > { %v1048_v44 = vadd.f32 %v1855_v10, %v1047_v41  ;;  %v1116_v55 = vadd.f32 %v1115_v42, %v1085_v40  ;;  %v1090_v10 = vmul.f32 %v1871_v38, %v1871_v38 }
 0x138   : > { %v1117_v46 = vadd.f32 %v1116_v55, %v1086_v43  ;;  %v1049_v47 = vadd.f32 %v1861_v19, %v1048_v44  ;;  %v1091_v19 = vmul.f32 %v1883_v53, %v1883_v53 }
 0x13a   : > { %v1050_v35 = vadd.f32 %v1863_v24, %v1049_v47  ;;  %v1118_v49 = vadd.f32 %v1117_v46, %v1087_v45 }
 0x13c   : > { %v1051_v50 = vadd.f32 %v1869_v33, %v1050_v35  ;;  %v1119_v51 = vadd.f32 %v1118_v49, %v1088_v60 }
 0x13e   : > { %v1052_v52 = vadd.f32 %v1871_v38, %v1051_v50  ;;  %v1120_v54 = vadd.f32 %v1119_v51, %v1089_v5 }
 0x140   : > { %v1053_v58 = vadd.f32 %v1883_v53, %v1052_v52  ;;  %v1121_v62 = vadd.f32 %v1120_v54, %v1090_v10  ;;  %v1094_v53 = vmul.f32 %v1893_v28, %v1893_v28 }
 0x142   : > { %v1054_v24 = vadd.f32 %v1885_v1, %v1053_v58  ;;  %v1122_v0 = vadd.f32 %v1121_v62, %v1091_v19  ;;  %v1095_v1 = vmul.f32 %v1899_v48, %v1899_v48 }
 0x144   : > { %v1123_v33 = vadd.f32 %v1122_v0, %v1092_v63  ;;  %v1055_v59 = vadd.f32 %v1891_v7, %v1054_v24  ;;  %v1096_v7 = vmul.f32 %v1901_v61, %v1901_v61 }
 0x146   : > { %v1124_v38 = vadd.f32 %v1123_v33, %v1093_v2  ;;  %v1056_v3 = vadd.f32 %v1893_v28, %v1055_v59 }
 0x148   : > { %v1125_v56 = vadd.f32 %v1124_v38, %v1094_v53  ;;  %v1057_v57 = vadd.f32 %v1899_v48, %v1056_v3 }
 0x14a   : > { %v1126_v4 = vadd.f32 %v1125_v56, %v1095_v1  ;;  %v1058_v8 = vadd.f32 %v1901_v61, %v1057_v57 }
 0x14c   : > { %v1127_v9 = vadd.f32 %v1126_v4, %v1096_v7  ;;  %v1059_v6 = vadd.f32 %v1572_v17, %v1058_v8 }
 0x14e   : > { %v1128_v12 = vadd.f32 %v1127_v9, %v1097_v11  ;;  %v1060_v13 = vadd.f32 %v1575_v26, %v1059_v6 }
 0x150   : > { %v1061_v28 = vrot.slane %v1060_v13, 4  ;;  %v1129_v15 = vadd.f32 %v1128_v12, %v1098_v14 }
 0x152   : > { %v1062_v16 = vadd.f32 %v1061_v28, %v1060_v13  ;;  %v1130_v18 = vrot.slane %v1129_v15, 4 }
 0x154   : > { %v1063_v22 = vrot.slane %v1062_v16, 2  ;;  %v1131_v48 = vadd.f32 %v1130_v18, %v1129_v15 }
 0x156   : > { %v1064_v23 = vadd.f32 %v1063_v22, %v1062_v16  ;;  %v1132_v25 = vrot.slane %v1131_v48, 2 }
 0x158   : > { %v1065_v27 = vrot.slane %v1064_v23, 1  ;;  %v1133_v20 = vadd.f32 %v1132_v25, %v1131_v48 }
 0x15a   : > { %v1134_v61 = vrot.slane %v1133_v20, 1  ;;  %v1066_v17 = vadd.f32 %v1065_v27, %v1064_v23 }
 0x15c   : > { %v1135_v26 = vadd.f32 %v1134_v61, %v1133_v20 }
 0x15e   : > { %v1137_v29 = vsel %vm1136_vm0, %v1066_v17, %v1135_v26 }
 0x15f   : > { %1138 = vst [vmem:[%s215_s10] sm:$0x3] %v1137_v29 }
 0x160 PF: > { %s14_s14 = sadd.s32 1, %s1702_s14   ;;  %s1969_s12 = smov %s1698_s13 }
 0x161   : > { %p11_p6 = scmp.ge.s32.totalorder %s14_s14, 4   ;;  %s1970_s13 = smov %s1972_s15 }
 0x163   :  { %13 = sbr.rel (!%p11_p6) target bundleno = 2 (0x2), region = 79 }

</bundles_post_ra>
